<compile_context>
chip_gen: v7x
topology: tpu7x:2x2x1
jax: 0.10.0
libtpu: 0.0.40
codegen_flags: <defaults>
</compile_context>

<pallas_src>
import functools
from typing import NamedTuple, Tuple

import jax
import jax.numpy as jnp
from jax.experimental import pallas as pl
from jax.experimental.pallas import tpu as pltpu


LANE = 128      # channel dims padded to multiples of the 128-wide lane dimension
TM_MAX = 512    # max flattened-output rows per kernel tile (measured sweet spot)


def _round_up(x, m):
    return (x + m - 1) // m * m


# ----------------------------------------------------------------------------- activations
class Act(NamedTuple):
    """Channel-padded NHWC activation. segments = ((real, padded), ...) along C."""
    data: jax.Array
    segments: Tuple[Tuple[int, int], ...]


def make_act(x_nhwc):
    c = int(x_nhwc.shape[-1])
    cp = _round_up(c, LANE)
    x = x_nhwc.astype(jnp.bfloat16)
    if cp != c:
        x = jnp.pad(x, ((0, 0), (0, 0), (0, 0), (0, cp - c)))
    return Act(x, ((c, cp),))


def act_concat(acts):
    data = jnp.concatenate([a.data for a in acts], axis=-1)
    segs = tuple(s for a in acts for s in a.segments)
    return Act(data, segs)


def upsample2x_nearest(act):
    # F.interpolate(scale_factor=2, mode='nearest'), NHWC.
    # TODO(synk): fold the 2x replication into the conv's input gather so the
    # upsampled map is never materialized in HBM.
    x = jnp.repeat(jnp.repeat(act.data, 2, axis=1), 2, axis=2)
    return Act(x, act.segments)


# ----------------------------------------------------------------------------- conv kernel
def _conv_tap_kernel(*refs, taps, relu, use_halo):
    """9-tap 3x3 conv tile: acc[t, co] = shift[co] + sum_k X[t + off_k, :] @ W_k, (+ReLU)."""
    if use_halo:
        x_cur, x_halo, w_ref, shift_ref, o_ref, acc_ref = refs
    else:
        x_cur, w_ref, shift_ref, o_ref, acc_ref = refs
        x_halo = None

    tm = o_ref.shape[1]
    # BN shift / conv bias folded into the accumulator init -> no extra epilogue add.
    acc_ref[...] = jnp.broadcast_to(shift_ref[...], acc_ref.shape)

    for k, (plane, off) in enumerate(taps):
        w_k = w_ref[k]                                          # (Cin_p, tn) bf16
        if off < tm:
            a = x_cur[0, plane, pl.ds(off, tm - off), :]        # (tm-off, Cin_p)
            acc_ref[pl.ds(0, tm - off), :] += jnp.dot(
                a, w_k, preferred_element_type=jnp.float32)
        if use_halo and off > 0:
            b = x_halo[0, plane, pl.ds(0, off), :]              # (off, Cin_p)
            acc_ref[pl.ds(tm - off, off), :] += jnp.dot(
                b, w_k, preferred_element_type=jnp.float32)

    y = acc_ref[...]                                            # f32
    if relu:
        y = jnp.maximum(y, 0.0)
    o_ref[0] = y.astype(o_ref.dtype)


def _pack_weight(w, scale, in_segments, cout_p):
    """[Cout,Cin,3,3] torch weight -> [9, Cin_padded_layout, Cout_p] bf16, BN scale folded."""
    cout, cin = int(w.shape[0]), int(w.shape[1])
    assert sum(r for r, _ in in_segments) == cin, (in_segments, cin)
    wf = (w * scale[:, None, None, None]).astype(jnp.float32)
    w9 = jnp.transpose(wf, (2, 3, 1, 0)).reshape(9, cin, cout)   # tap index = kh*3 + kw
    pieces, cur = [], 0
    for real, padded in in_segments:
        seg = w9[:, cur:cur + real, :]
        if padded != real:
            seg = jnp.pad(seg, ((0, 0), (0, padded - real), (0, 0)))
        pieces.append(seg)
        cur += real
    wp = pieces[0] if len(pieces) == 1 else jnp.concatenate(pieces, axis=1)
    if cout_p != cout:
        wp = jnp.pad(wp, ((0, 0), (0, 0), (0, cout_p - cout)))
    return wp.astype(jnp.bfloat16)


def _conv_planes(x, stride):
    """Pad and (for stride 2) parity-decompose so every tap is a stride-1 flat offset."""
    N, H, W, Cp = x.shape
    s = stride
    xp = jnp.pad(x, ((0, 0), (1, 1), (1, 1), (0, 0)))
    Hp, Wp = H + 2, W + 2
    Ho = (H - 1) // s + 1
    Wo = (W - 1) // s + 1
    if s == 1:
        planes = xp[:, None]                                    # (N, 1, Hp, Wp, Cp)
        Hq, Wq = Hp, Wp
    else:
        Hq, Wq = -(-Hp // s), -(-Wp // s)
        xq = jnp.pad(xp, ((0, 0), (0, s * Hq - Hp), (0, s * Wq - Wp), (0, 0)))
        planes = jnp.stack(
            [xq[:, py::s, px::s, :] for py in range(s) for px in range(s)], axis=1)
    taps = []
    for dy in range(3):
        for dx in range(3):
            taps.append(((dy % s) * s + (dx % s), (dy // s) * Wq + (dx // s)))
    return planes, taps, Ho, Wo, Hq, Wq


def conv3x3_affine_act(act, w, scale, shift, *, stride=1, relu=True,
                       out_f32=False, tm_max=TM_MAX):
    """3x3 conv, padding=1, given stride; fused per-channel affine + optional ReLU.

    act:    NHWC Act (channels padded to 128)     w: [Cout, Cin, 3, 3] (PyTorch layout)
    scale/shift: [Cout]  (folded BatchNorm, or scale=1 / shift=bias)
    returns Act with NHWC data [N, Ho, Wo, Cout_padded]
    """
    x = act.data
    N, H, W, Cin_p = x.shape
    Cout = int(w.shape[0])
    Cout_p = _round_up(Cout, LANE)

    wp = _pack_weight(w, scale, act.segments, Cout_p)           # (9, Cin_p, Cout_p) bf16
    shiftp = jnp.pad(shift.astype(jnp.float32), (0, Cout_p - Cout)).reshape(1, Cout_p)

    planes, taps, Ho, Wo, Hq, Wq = _conv_planes(x, stride)
    P = planes.shape[1]
    T_real = Hq * Wq
    T_out = Ho * Wq
    max_off = max(off for _, off in taps)

    if _round_up(T_real, 8) <= tm_max:
        # whole (padded, flattened) image fits one row tile: no halo view needed
        tm, n_tb, use_halo = _round_up(T_real, 8), 1, False
        halo = 0
        T_alloc = tm
    else:
        # halo = just enough rows past the tile for the largest tap offset;
        # tile size is a multiple of the halo so the halo view blocks cleanly.
        halo = _round_up(max_off, 8)
        tm = pl.cdiv(max(tm_max, halo), halo) * halo
        n_tb = pl.cdiv(T_out, tm)
        use_halo = True
        T_alloc = n_tb * tm + halo

    Xf = planes.reshape(N, P, T_real, Cin_p)
    Xf = jnp.pad(Xf, ((0, 0), (0, 0), (0, T_alloc - T_real), (0, 0)))

    tn = 256 if Cout_p % 256 == 0 else 128                      # feed the 256-wide MXU when possible
    n_cb = Cout_p // tn
    out_dtype = jnp.float32 if out_f32 else jnp.bfloat16

    in_specs = [pl.BlockSpec((1, P, tm, Cin_p), lambda n, t, c: (n, 0, t, 0))]
    operands = [Xf]
    if use_halo:
        sb = tm // halo                                          # halo blocks per tile
        in_specs.append(pl.BlockSpec(
            (1, P, halo, Cin_p), lambda n, t, c, sb=sb: (n, 0, (t + 1) * sb, 0)))
        operands.append(Xf)
    in_specs += [
        pl.BlockSpec((9, Cin_p, tn), lambda n, t, c: (0, 0, c)),
        pl.BlockSpec((1, tn), lambda n, t, c: (0, c)),
    ]
    operands += [wp, shiftp]

    kernel = functools.partial(_conv_tap_kernel, taps=tuple(taps), relu=relu,
                               use_halo=use_halo)

    in_rows = tm + (halo if use_halo else 0)
    flops = 2 * N * n_tb * tm * 9 * Cin_p * Cout_p
    bytes_accessed = (N * n_tb * P * in_rows * Cin_p * 2
                      + N * n_tb * 9 * Cin_p * Cout_p * 2
                      + N * n_tb * tm * Cout_p * (4 if out_f32 else 2))

    y = pl.pallas_call(
        kernel,
        out_shape=jax.ShapeDtypeStruct((N, n_tb * tm, Cout_p), out_dtype),
        grid_spec=pltpu.PrefetchScalarGridSpec(
            num_scalar_prefetch=0,
            grid=(N, n_tb, n_cb),
            in_specs=in_specs,
            out_specs=pl.BlockSpec((1, tm, tn), lambda n, t, c: (n, t, c)),
            scratch_shapes=[pltpu.VMEM((tm, tn), jnp.float32)],
        ),
        compiler_params=pltpu.CompilerParams(
            dimension_semantics=("parallel", "parallel", "parallel"),
            vmem_limit_bytes=32 * 1024 * 1024,
        ),
        cost_estimate=pl.CostEstimate(
            flops=flops, transcendentals=0, bytes_accessed=bytes_accessed),
    )(*operands)

    y = y[:, :T_out, :].reshape(N, Ho, Wq, Cout_p)[:, :, :Wo, :]
    return Act(y, ((Cout, Cout_p),))


# ----------------------------------------------------------------------------- params
def init_conv_bn(key, cin, cout):
    # Conv2d(bias=False) + BatchNorm2d (eval, fresh init -> identity affine)
    w = jax.random.normal(key, (cout, cin, 3, 3), jnp.float32) * (1.0 / (cin * 9) ** 0.5)
    return dict(w=w, scale=jnp.ones((cout,), jnp.float32), shift=jnp.zeros((cout,), jnp.float32))


def init_conv_bias(key, cin, cout):
    kw, kb = jax.random.split(key)
    w = jax.random.normal(kw, (cout, cin, 3, 3), jnp.float32) * (1.0 / (cin * 9) ** 0.5)
    b = jax.random.normal(kb, (cout,), jnp.float32) * 0.01
    return dict(w=w, scale=jnp.ones((cout,), jnp.float32), shift=b)


def init_decoder(key, encoder_out_channels, decoder_channels):
    # mirrors UnetPlusPlusDecoder.__init__ channel bookkeeping exactly
    enc_ch = list(encoder_out_channels)[1:][::-1]
    head = enc_ch[0]
    in_chs = [head] + list(decoder_channels[:-1])
    skip_chs = list(enc_ch[1:]) + [0]
    out_chs = list(decoder_channels)
    depth = len(in_chs) - 1

    keys = iter(jax.random.split(key, 4 * len(in_chs) * len(in_chs)))

    def block_params(in_ch, skip_ch, out_ch):
        return dict(
            conv1=init_conv_bn(next(keys), in_ch + skip_ch, out_ch),
            conv2=init_conv_bn(next(keys), out_ch, out_ch),
        )

    blocks = {}
    for layer_idx in range(len(in_chs) - 1):
        for depth_idx in range(layer_idx + 1):
            if depth_idx == 0:
                in_ch = in_chs[layer_idx]
                skip_ch = skip_chs[layer_idx] * (layer_idx + 1)
                out_ch = out_chs[layer_idx]
            else:
                out_ch = skip_chs[layer_idx]
                skip_ch = skip_chs[layer_idx] * (layer_idx + 1 - depth_idx)
                in_ch = skip_chs[layer_idx - 1]
            blocks[f'x_{depth_idx}_{layer_idx}'] = block_params(in_ch, skip_ch, out_ch)
    blocks[f'x_{0}_{len(in_chs) - 1}'] = block_params(in_chs[-1], 0, out_chs[-1])
    return blocks, depth


def init_smpnet(key, in_channels, n_class, encoder_out_channels, decoder_channels):
    k_enc, k_dec, k_head = jax.random.split(key, 3)
    enc_keys = jax.random.split(k_enc, len(encoder_out_channels) - 1)
    encoder = [
        init_conv_bn(enc_keys[i], encoder_out_channels[i], encoder_out_channels[i + 1])
        for i in range(len(encoder_out_channels) - 1)
    ]
    decoder, depth = init_decoder(k_dec, encoder_out_channels, decoder_channels)
    seg_head = init_conv_bias(k_head, decoder_channels[-1], n_class)
    return dict(encoder=encoder, decoder=decoder, depth=depth, seg_head=seg_head)


# ----------------------------------------------------------------------------- forward
def conv2d_relu_apply(act, p):
    return conv3x3_affine_act(act, p['w'], p['scale'], p['shift'], stride=1, relu=True)


def decoder_block_apply(p, x, skip=None):
    x = upsample2x_nearest(x)
    if skip is not None:
        x = act_concat([x, skip])          # attention1 = Identity (attention_type=None)
    # TODO(synk): fuse the conv1->conv2 pair into one pallas_call so the intermediate
    # activation stays in VMEM instead of round-tripping through HBM.
    x = conv2d_relu_apply(x, p['conv1'])
    x = conv2d_relu_apply(x, p['conv2'])
    return x                               # attention2 = Identity


def encoder_apply(enc_params, act):
    feats = [act]                          # depth-0 identity feature (SMP convention)
    h = act
    for p in enc_params:
        h = conv3x3_affine_act(h, p['w'], p['scale'], p['shift'], stride=2, relu=True)
        feats.append(h)
    return feats


def decoder_apply(blocks, depth, *features):
    # mirrors UnetPlusPlusDecoder.forward exactly
    features = features[1:]
    features = features[::-1]
    dense_x = {}
    for layer_idx in range(depth):
        for depth_idx in range(depth - layer_idx):
            if layer_idx == 0:
                output = decoder_block_apply(
                    blocks[f'x_{depth_idx}_{depth_idx}'],
                    features[depth_idx], features[depth_idx + 1])
                dense_x[f'x_{depth_idx}_{depth_idx}'] = output
            else:
                dense_l_i = depth_idx + layer_idx
                cat_features = [dense_x[f'x_{idx}_{dense_l_i}']
                                for idx in range(depth_idx + 1, dense_l_i + 1)]
                cat_features = act_concat(cat_features + [features[dense_l_i + 1]])
                dense_x[f'x_{depth_idx}_{dense_l_i}'] = decoder_block_apply(
                    blocks[f'x_{depth_idx}_{dense_l_i}'],
                    dense_x[f'x_{depth_idx}_{dense_l_i - 1}'], cat_features)
    dense_x[f'x_{0}_{depth}'] = decoder_block_apply(
        blocks[f'x_{0}_{depth}'], dense_x[f'x_{0}_{depth - 1}'], None)
    return dense_x[f'x_{0}_{depth}']


def smpnet_forward(params, x_nchw):
    x = jnp.transpose(x_nchw, (0, 2, 3, 1))        # single NCHW -> NHWC at the input
    act = make_act(x)
    feats = encoder_apply(params['encoder'], act)
    dec = decoder_apply(params['decoder'], params['depth'], *feats)
    # SegmentationHead: Conv2d(k=3, pad=1, bias) + Identity upsampling + Identity activation
    p = params['seg_head']
    head = conv3x3_affine_act(dec, p['w'], p['scale'], p['shift'],
                              stride=1, relu=False, out_f32=True)
    n_class = int(p['w'].shape[0])
    y = head.data[..., :n_class]
    return jnp.transpose(y, (0, 3, 1, 2))          # NHWC -> NCHW (match PyTorch)


# ----------------------------------------------------------------------------- main
if __name__ == "__main__":
    key = jax.random.PRNGKey(0)
    k_param, k_x, k_t = jax.random.split(key, 3)

    # --- self-check of the conv kernel (both single-tile and halo'd multi-tile paths)
    def ref_conv(x, w, scale, shift, stride, relu):
        w_hwio = jnp.transpose(w * scale[:, None, None, None], (2, 3, 1, 0))
        y = jax.lax.conv_general_dilated(
            x, w_hwio, (stride, stride), ((1, 1), (1, 1)),
            dimension_numbers=("NHWC", "HWIO", "NHWC"))
        y = y + shift
        return jnp.maximum(y, 0.0) if relu else y

    kt = jax.random.split(k_t, 3)
    xt = jax.random.normal(kt[0], (2, 19, 13, 5), jnp.float32)
    wt = jax.random.normal(kt[1], (7, 5, 3, 3), jnp.float32) * 0.15
    sh = jax.random.normal(kt[2], (7,), jnp.float32) * 0.1
    sc = jnp.full((7,), 1.1, jnp.float32)
    for stride in (1, 2):
        for tm_cap in (8, TM_MAX):                 # tm_cap=8 forces the multi-tile/halo path
            got = conv3x3_affine_act(make_act(xt), wt, sc, sh, stride=stride,
                                     relu=True, out_f32=True, tm_max=tm_cap)
            want = ref_conv(xt, wt, sc, sh, stride, True)
            err = float(jnp.max(jnp.abs(got.data[..., :7] - want)))
            assert err < 0.1, ("conv mismatch", stride, tm_cap, err)

    # --- full SmpNet forward
    N, IN_CH, H, W = 2, 3, 32, 32            # depth-5 pyramid bottoms out at 1x1
    N_CLASS = 10
    ENC_OUT_CH = (IN_CH, 8, 16, 24, 32, 40)  # synthetic encoder channel plan (see TODO)
    DEC_CH = (32, 24, 16, 16, 8)             # small stand-in for (256, 128, 64, 32, 16)

    params = init_smpnet(k_param, IN_CH, N_CLASS, ENC_OUT_CH, DEC_CH)
    x = jax.random.normal(k_x, (N, IN_CH, H, W), jnp.float32)

    fwd = jax.jit(lambda inp: smpnet_forward(params, inp))
    out = fwd(x)
    jax.block_until_ready(out)

    assert out.shape == (N, N_CLASS, H, W), out.shape
    assert out.dtype == jnp.float32
    print("KERNEL_OK")
</pallas_src>

<mosaic_0001>
module attributes {stable_mosaic.version = 11 : i64} {
  func.func @_conv_tap_kernel(%arg0: i32, %arg1: i32, %arg2: i32, %arg3: memref<1x1x32x128xbf16, #tpu.memory_space<vmem>>, %arg4: memref<1x1x32x128xbf16, #tpu.memory_space<vmem>>, %arg5: memref<9x128x128xbf16, #tpu.memory_space<vmem>>, %arg6: memref<1x128xf32, #tpu.memory_space<vmem>>, %arg7: memref<1x32x128xf32, #tpu.memory_space<vmem>>, %arg8: memref<32x128xf32, #tpu.memory_space<vmem>>) attributes {dimension_semantics = [#tpu.dimension_semantics<parallel>, #tpu.dimension_semantics<parallel>, #tpu.dimension_semantics<parallel>], iteration_bounds = array<i64: 2, 9, 1>, scalar_prefetch = 0 : i64, scratch_operands = 1 : i64, tpu.core_type = #tpu.core_type<tc>, window_params = [{transform_indices = @transform_0, window_bounds = array<i64: 1, 1, 32, 128>}, {transform_indices = @transform_1, window_bounds = array<i64: 1, 1, 32, 128>}, {transform_indices = @transform_2, window_bounds = array<i64: 9, 128, 128>}, {transform_indices = @transform_3, window_bounds = array<i64: 1, 128>}, {transform_indices = @transform_4, window_bounds = array<i64: 1, 32, 128>}]} {
    %c0 = arith.constant 0 : index
    %c0_0 = arith.constant 0 : index
    %0 = vector.load %arg6[%c0, %c0_0] : memref<1x128xf32, #tpu.memory_space<vmem>>, vector<1x128xf32>
    %1 = vector.shape_cast %0 : vector<1x128xf32> to vector<1x128xf32>
    %2 = vector.broadcast %1 : vector<1x128xf32> to vector<32x128xf32>
    %c0_1 = arith.constant 0 : index
    %c0_2 = arith.constant 0 : index
    %3 = vector.load %arg8[%c0_1, %c0_2] : memref<32x128xf32, #tpu.memory_space<vmem>>, vector<32x128xf32>
    tpu.vector_store %arg8[%c0_1, %c0_2], %2 {strides = array<i32>} : memref<32x128xf32, #tpu.memory_space<vmem>>, vector<32x128xf32>,
    %c0_3 = arith.constant 0 : index
    %c0_4 = arith.constant 0 : index
    %c0_5 = arith.constant 0 : index
    %4 = vector.load %arg5[%c0_3, %c0_4, %c0_5] : memref<9x128x128xbf16, #tpu.memory_space<vmem>>, vector<1x128x128xbf16>
    %5 = vector.shape_cast %4 : vector<1x128x128xbf16> to vector<128x128xbf16>
    %c0_6 = arith.constant 0 : index
    %c0_7 = arith.constant 0 : index
    %c0_8 = arith.constant 0 : index
    %c0_9 = arith.constant 0 : index
    %6 = vector.load %arg3[%c0_6, %c0_7, %c0_8, %c0_9] : memref<1x1x32x128xbf16, #tpu.memory_space<vmem>>, vector<1x1x32x128xbf16>
    %7 = vector.shape_cast %6 : vector<1x1x32x128xbf16> to vector<32x128xbf16>
    %c0_10 = arith.constant 0 : index
    %c0_11 = arith.constant 0 : index
    %8 = vector.load %arg8[%c0_10, %c0_11] : memref<32x128xf32, #tpu.memory_space<vmem>>, vector<32x128xf32>
    %cst = arith.constant dense<0.000000e+00> : vector<32x128xf32>
    %9 = tpu.matmul %7, %5, %cst {dimension_numbers = #tpu.dot_dimension_numbers<[1], [0], [0], [1], [0, 0, 1, 1], [], []>} : vector<32x128xbf16>, vector<128x128xbf16>, vector<32x128xf32> -> vector<32x128xf32>
    %10 = arith.addf %8, %9 : vector<32x128xf32>
    %c0_12 = arith.constant 0 : index
    %c0_13 = arith.constant 0 : index
    %11 = vector.load %arg8[%c0_12, %c0_13] : memref<32x128xf32, #tpu.memory_space<vmem>>, vector<32x128xf32>
    tpu.vector_store %arg8[%c0_12, %c0_13], %10 {strides = array<i32>} : memref<32x128xf32, #tpu.memory_space<vmem>>, vector<32x128xf32>,
    %c1 = arith.constant 1 : index
    %c0_14 = arith.constant 0 : index
    %c0_15 = arith.constant 0 : index
    %12 = vector.load %arg5[%c1, %c0_14, %c0_15] : memref<9x128x128xbf16, #tpu.memory_space<vmem>>, vector<1x128x128xbf16>
    %13 = vector.shape_cast %12 : vector<1x128x128xbf16> to vector<128x128xbf16>
    %c0_16 = arith.constant 0 : index
    %c0_17 = arith.constant 0 : index
    %c1_18 = arith.constant 1 : index
    %c0_19 = arith.constant 0 : index
    %14 = vector.load %arg3[%c0_16, %c0_17, %c1_18, %c0_19] : memref<1x1x32x128xbf16, #tpu.memory_space<vmem>>, vector<1x1x31x128xbf16>
    %15 = vector.shape_cast %14 : vector<1x1x31x128xbf16> to vector<31x128xbf16>
    %c0_20 = arith.constant 0 : index
    %c0_21 = arith.constant 0 : index
    %16 = vector.load %arg8[%c0_20, %c0_21] : memref<32x128xf32, #tpu.memory_space<vmem>>, vector<31x128xf32>
    %cst_22 = arith.constant dense<0.000000e+00> : vector<31x128xf32>
    %17 = tpu.matmul %15, %13, %cst_22 {dimension_numbers = #tpu.dot_dimension_numbers<[1], [0], [0], [1], [0, 0, 1, 1], [], []>} : vector<31x128xbf16>, vector<128x128xbf16>, vector<31x128xf32> -> vector<31x128xf32>
    %18 = arith.addf %16, %17 : vector<31x128xf32>
    %c0_23 = arith.constant 0 : index
    %c0_24 = arith.constant 0 : index
    %19 = vector.load %arg8[%c0_23, %c0_24] : memref<32x128xf32, #tpu.memory_space<vmem>>, vector<31x128xf32>
    tpu.vector_store %arg8[%c0_23, %c0_24], %18 {strides = array<i32>} : memref<32x128xf32, #tpu.memory_space<vmem>>, vector<31x128xf32>,
    %c0_25 = arith.constant 0 : index
    %c0_26 = arith.constant 0 : index
    %c0_27 = arith.constant 0 : index
    %c0_28 = arith.constant 0 : index
    %20 = vector.load %arg4[%c0_25, %c0_26, %c0_27, %c0_28] : memref<1x1x32x128xbf16, #tpu.memory_space<vmem>>, vector<1x1x1x128xbf16>
    %21 = vector.shape_cast %20 : vector<1x1x1x128xbf16> to vector<1x128xbf16>
    %c31 = arith.constant 31 : index
    %c0_29 = arith.constant 0 : index
    %22 = vector.load %arg8[%c31, %c0_29] : memref<32x128xf32, #tpu.memory_space<vmem>>, vector<1x128xf32>
    %cst_30 = arith.constant dense<0.000000e+00> : vector<1x128xf32>
    %23 = tpu.matmul %21, %13, %cst_30 {dimension_numbers = #tpu.dot_dimension_numbers<[1], [0], [0], [1], [0, 0, 1, 1], [], []>} : vector<1x128xbf16>, vector<128x128xbf16>, vector<1x128xf32> -> vector<1x128xf32>
    %24 = arith.addf %22, %23 : vector<1x128xf32>
    %c31_31 = arith.constant 31 : index
    %c0_32 = arith.constant 0 : index
    %25 = vector.load %arg8[%c31_31, %c0_32] : memref<32x128xf32, #tpu.memory_space<vmem>>, vector<1x128xf32>
    tpu.vector_store %arg8[%c31_31, %c0_32], %24 {strides = array<i32>} : memref<32x128xf32, #tpu.memory_space<vmem>>, vector<1x128xf32>,
    %c2 = arith.constant 2 : index
    %c0_33 = arith.constant 0 : index
    %c0_34 = arith.constant 0 : index
    %26 = vector.load %arg5[%c2, %c0_33, %c0_34] : memref<9x128x128xbf16, #tpu.memory_space<vmem>>, vector<1x128x128xbf16>
    %27 = vector.shape_cast %26 : vector<1x128x128xbf16> to vector<128x128xbf16>
    %c0_35 = arith.constant 0 : index
    %c0_36 = arith.constant 0 : index
    %c2_37 = arith.constant 2 : index
    %c0_38 = arith.constant 0 : index
    %28 = vector.load %arg3[%c0_35, %c0_36, %c2_37, %c0_38] : memref<1x1x32x128xbf16, #tpu.memory_space<vmem>>, vector<1x1x30x128xbf16>
    %29 = vector.shape_cast %28 : vector<1x1x30x128xbf16> to vector<30x128xbf16>
    %c0_39 = arith.constant 0 : index
    %c0_40 = arith.constant 0 : index
    %30 = vector.load %arg8[%c0_39, %c0_40] : memref<32x128xf32, #tpu.memory_space<vmem>>, vector<30x128xf32>
    %cst_41 = arith.constant dense<0.000000e+00> : vector<30x128xf32>
    %31 = tpu.matmul %29, %27, %cst_41 {dimension_numbers = #tpu.dot_dimension_numbers<[1], [0], [0], [1], [0, 0, 1, 1], [], []>} : vector<30x128xbf16>, vector<128x128xbf16>, vector<30x128xf32> -> vector<30x128xf32>
    %32 = arith.addf %30, %31 : vector<30x128xf32>
    %c0_42 = arith.constant 0 : index
    %c0_43 = arith.constant 0 : index
    %33 = vector.load %arg8[%c0_42, %c0_43] : memref<32x128xf32, #tpu.memory_space<vmem>>, vector<30x128xf32>
    tpu.vector_store %arg8[%c0_42, %c0_43], %32 {strides = array<i32>} : memref<32x128xf32, #tpu.memory_space<vmem>>, vector<30x128xf32>,
    %c0_44 = arith.constant 0 : index
    %c0_45 = arith.constant 0 : index
    %c0_46 = arith.constant 0 : index
    %c0_47 = arith.constant 0 : index
    %34 = vector.load %arg4[%c0_44, %c0_45, %c0_46, %c0_47] : memref<1x1x32x128xbf16, #tpu.memory_space<vmem>>, vector<1x1x2x128xbf16>
    %35 = vector.shape_cast %34 : vector<1x1x2x128xbf16> to vector<2x128xbf16>
    %c30 = arith.constant 30 : index
    %c0_48 = arith.constant 0 : index
    %36 = vector.load %arg8[%c30, %c0_48] : memref<32x128xf32, #tpu.memory_space<vmem>>, vector<2x128xf32>
    %cst_49 = arith.constant dense<0.000000e+00> : vector<2x128xf32>
    %37 = tpu.matmul %35, %27, %cst_49 {dimension_numbers = #tpu.dot_dimension_numbers<[1], [0], [0], [1], [0, 0, 1, 1], [], []>} : vector<2x128xbf16>, vector<128x128xbf16>, vector<2x128xf32> -> vector<2x128xf32>
    %38 = arith.addf %36, %37 : vector<2x128xf32>
    %c30_50 = arith.constant 30 : index
    %c0_51 = arith.constant 0 : index
    %39 = vector.load %arg8[%c30_50, %c0_51] : memref<32x128xf32, #tpu.memory_space<vmem>>, vector<2x128xf32>
    tpu.vector_store %arg8[%c30_50, %c0_51], %38 {strides = array<i32>} : memref<32x128xf32, #tpu.memory_space<vmem>>, vector<2x128xf32>,
    %c3 = arith.constant 3 : index
    %c0_52 = arith.constant 0 : index
    %c0_53 = arith.constant 0 : index
    %40 = vector.load %arg5[%c3, %c0_52, %c0_53] : memref<9x128x128xbf16, #tpu.memory_space<vmem>>, vector<1x128x128xbf16>
    %41 = vector.shape_cast %40 : vector<1x128x128xbf16> to vector<128x128xbf16>
    %c0_54 = arith.constant 0 : index
    %c0_55 = arith.constant 0 : index
    %c15 = arith.constant 15 : index
    %c0_56 = arith.constant 0 : index
    %42 = vector.load %arg3[%c0_54, %c0_55, %c15, %c0_56] : memref<1x1x32x128xbf16, #tpu.memory_space<vmem>>, vector<1x1x17x128xbf16>
    %43 = vector.shape_cast %42 : vector<1x1x17x128xbf16> to vector<17x128xbf16>
    %c0_57 = arith.constant 0 : index
    %c0_58 = arith.constant 0 : index
    %44 = vector.load %arg8[%c0_57, %c0_58] : memref<32x128xf32, #tpu.memory_space<vmem>>, vector<17x128xf32>
    %cst_59 = arith.constant dense<0.000000e+00> : vector<17x128xf32>
    %45 = tpu.matmul %43, %41, %cst_59 {dimension_numbers = #tpu.dot_dimension_numbers<[1], [0], [0], [1], [0, 0, 1, 1], [], []>} : vector<17x128xbf16>, vector<128x128xbf16>, vector<17x128xf32> -> vector<17x128xf32>
    %46 = arith.addf %44, %45 : vector<17x128xf32>
    %c0_60 = arith.constant 0 : index
    %c0_61 = arith.constant 0 : index
    %47 = vector.load %arg8[%c0_60, %c0_61] : memref<32x128xf32, #tpu.memory_space<vmem>>, vector<17x128xf32>
    tpu.vector_store %arg8[%c0_60, %c0_61], %46 {strides = array<i32>} : memref<32x128xf32, #tpu.memory_space<vmem>>, vector<17x128xf32>,
    %c0_62 = arith.constant 0 : index
    %c0_63 = arith.constant 0 : index
    %c0_64 = arith.constant 0 : index
    %c0_65 = arith.constant 0 : index
    %48 = vector.load %arg4[%c0_62, %c0_63, %c0_64, %c0_65] : memref<1x1x32x128xbf16, #tpu.memory_space<vmem>>, vector<1x1x15x128xbf16>
    %49 = vector.shape_cast %48 : vector<1x1x15x128xbf16> to vector<15x128xbf16>
    %c17 = arith.constant 17 : index
    %c0_66 = arith.constant 0 : index
    %50 = vector.load %arg8[%c17, %c0_66] : memref<32x128xf32, #tpu.memory_space<vmem>>, vector<15x128xf32>
    %cst_67 = arith.constant dense<0.000000e+00> : vector<15x128xf32>
    %51 = tpu.matmul %49, %41, %cst_67 {dimension_numbers = #tpu.dot_dimension_numbers<[1], [0], [0], [1], [0, 0, 1, 1], [], []>} : vector<15x128xbf16>, vector<128x128xbf16>, vector<15x128xf32> -> vector<15x128xf32>
    %52 = arith.addf %50, %51 : vector<15x128xf32>
    %c17_68 = arith.constant 17 : index
    %c0_69 = arith.constant 0 : index
    %53 = vector.load %arg8[%c17_68, %c0_69] : memref<32x128xf32, #tpu.memory_space<vmem>>, vector<15x128xf32>
    tpu.vector_store %arg8[%c17_68, %c0_69], %52 {strides = array<i32>} : memref<32x128xf32, #tpu.memory_space<vmem>>, vector<15x128xf32>,
    %c4 = arith.constant 4 : index
    %c0_70 = arith.constant 0 : index
    %c0_71 = arith.constant 0 : index
    %54 = vector.load %arg5[%c4, %c0_70, %c0_71] : memref<9x128x128xbf16, #tpu.memory_space<vmem>>, vector<1x128x128xbf16>
    %55 = vector.shape_cast %54 : vector<1x128x128xbf16> to vector<128x128xbf16>
    %c0_72 = arith.constant 0 : index
    %c0_73 = arith.constant 0 : index
    %c16 = arith.constant 16 : index
    %c0_74 = arith.constant 0 : index
    %56 = vector.load %arg3[%c0_72, %c0_73, %c16, %c0_74] : memref<1x1x32x128xbf16, #tpu.memory_space<vmem>>, vector<1x1x16x128xbf16>
    %57 = vector.shape_cast %56 : vector<1x1x16x128xbf16> to vector<16x128xbf16>
    %c0_75 = arith.constant 0 : index
    %c0_76 = arith.constant 0 : index
    %58 = vector.load %arg8[%c0_75, %c0_76] : memref<32x128xf32, #tpu.memory_space<vmem>>, vector<16x128xf32>
    %cst_77 = arith.constant dense<0.000000e+00> : vector<16x128xf32>
    %59 = tpu.matmul %57, %55, %cst_77 {dimension_numbers = #tpu.dot_dimension_numbers<[1], [0], [0], [1], [0, 0, 1, 1], [], []>} : vector<16x128xbf16>, vector<128x128xbf16>, vector<16x128xf32> -> vector<16x128xf32>
    %60 = arith.addf %58, %59 : vector<16x128xf32>
    %c0_78 = arith.constant 0 : index
    %c0_79 = arith.constant 0 : index
    %61 = vector.load %arg8[%c0_78, %c0_79] : memref<32x128xf32, #tpu.memory_space<vmem>>, vector<16x128xf32>
    tpu.vector_store %arg8[%c0_78, %c0_79], %60 {strides = array<i32>} : memref<32x128xf32, #tpu.memory_space<vmem>>, vector<16x128xf32>,
    %c0_80 = arith.constant 0 : index
    %c0_81 = arith.constant 0 : index
    %c0_82 = arith.constant 0 : index
    %c0_83 = arith.constant 0 : index
    %62 = vector.load %arg4[%c0_80, %c0_81, %c0_82, %c0_83] : memref<1x1x32x128xbf16, #tpu.memory_space<vmem>>, vector<1x1x16x128xbf16>
    %63 = vector.shape_cast %62 : vector<1x1x16x128xbf16> to vector<16x128xbf16>
    %c16_84 = arith.constant 16 : index
    %c0_85 = arith.constant 0 : index
    %64 = vector.load %arg8[%c16_84, %c0_85] : memref<32x128xf32, #tpu.memory_space<vmem>>, vector<16x128xf32>
    %cst_86 = arith.constant dense<0.000000e+00> : vector<16x128xf32>
    %65 = tpu.matmul %63, %55, %cst_86 {dimension_numbers = #tpu.dot_dimension_numbers<[1], [0], [0], [1], [0, 0, 1, 1], [], []>} : vector<16x128xbf16>, vector<128x128xbf16>, vector<16x128xf32> -> vector<16x128xf32>
    %66 = arith.addf %64, %65 : vector<16x128xf32>
    %c16_87 = arith.constant 16 : index
    %c0_88 = arith.constant 0 : index
    %67 = vector.load %arg8[%c16_87, %c0_88] : memref<32x128xf32, #tpu.memory_space<vmem>>, vector<16x128xf32>
    tpu.vector_store %arg8[%c16_87, %c0_88], %66 {strides = array<i32>} : memref<32x128xf32, #tpu.memory_space<vmem>>, vector<16x128xf32>,
    %c5 = arith.constant 5 : index
    %c0_89 = arith.constant 0 : index
    %c0_90 = arith.constant 0 : index
    %68 = vector.load %arg5[%c5, %c0_89, %c0_90] : memref<9x128x128xbf16, #tpu.memory_space<vmem>>, vector<1x128x128xbf16>
    %69 = vector.shape_cast %68 : vector<1x128x128xbf16> to vector<128x128xbf16>
    %c0_91 = arith.constant 0 : index
    %c0_92 = arith.constant 0 : index
    %c17_93 = arith.constant 17 : index
    %c0_94 = arith.constant 0 : index
    %70 = vector.load %arg3[%c0_91, %c0_92, %c17_93, %c0_94] : memref<1x1x32x128xbf16, #tpu.memory_space<vmem>>, vector<1x1x15x128xbf16>
    %71 = vector.shape_cast %70 : vector<1x1x15x128xbf16> to vector<15x128xbf16>
    %c0_95 = arith.constant 0 : index
    %c0_96 = arith.constant 0 : index
    %72 = vector.load %arg8[%c0_95, %c0_96] : memref<32x128xf32, #tpu.memory_space<vmem>>, vector<15x128xf32>
    %cst_97 = arith.constant dense<0.000000e+00> : vector<15x128xf32>
    %73 = tpu.matmul %71, %69, %cst_97 {dimension_numbers = #tpu.dot_dimension_numbers<[1], [0], [0], [1], [0, 0, 1, 1], [], []>} : vector<15x128xbf16>, vector<128x128xbf16>, vector<15x128xf32> -> vector<15x128xf32>
    %74 = arith.addf %72, %73 : vector<15x128xf32>
    %c0_98 = arith.constant 0 : index
    %c0_99 = arith.constant 0 : index
    %75 = vector.load %arg8[%c0_98, %c0_99] : memref<32x128xf32, #tpu.memory_space<vmem>>, vector<15x128xf32>
    tpu.vector_store %arg8[%c0_98, %c0_99], %74 {strides = array<i32>} : memref<32x128xf32, #tpu.memory_space<vmem>>, vector<15x128xf32>,
    %c0_100 = arith.constant 0 : index
    %c0_101 = arith.constant 0 : index
    %c0_102 = arith.constant 0 : index
    %c0_103 = arith.constant 0 : index
    %76 = vector.load %arg4[%c0_100, %c0_101, %c0_102, %c0_103] : memref<1x1x32x128xbf16, #tpu.memory_space<vmem>>, vector<1x1x17x128xbf16>
    %77 = vector.shape_cast %76 : vector<1x1x17x128xbf16> to vector<17x128xbf16>
    %c15_104 = arith.constant 15 : index
    %c0_105 = arith.constant 0 : index
    %78 = vector.load %arg8[%c15_104, %c0_105] : memref<32x128xf32, #tpu.memory_space<vmem>>, vector<17x128xf32>
    %cst_106 = arith.constant dense<0.000000e+00> : vector<17x128xf32>
    %79 = tpu.matmul %77, %69, %cst_106 {dimension_numbers = #tpu.dot_dimension_numbers<[1], [0], [0], [1], [0, 0, 1, 1], [], []>} : vector<17x128xbf16>, vector<128x128xbf16>, vector<17x128xf32> -> vector<17x128xf32>
    %80 = arith.addf %78, %79 : vector<17x128xf32>
    %c15_107 = arith.constant 15 : index
    %c0_108 = arith.constant 0 : index
    %81 = vector.load %arg8[%c15_107, %c0_108] : memref<32x128xf32, #tpu.memory_space<vmem>>, vector<17x128xf32>
    tpu.vector_store %arg8[%c15_107, %c0_108], %80 {strides = array<i32>} : memref<32x128xf32, #tpu.memory_space<vmem>>, vector<17x128xf32>,
    %c6 = arith.constant 6 : index
    %c0_109 = arith.constant 0 : index
    %c0_110 = arith.constant 0 : index
    %82 = vector.load %arg5[%c6, %c0_109, %c0_110] : memref<9x128x128xbf16, #tpu.memory_space<vmem>>, vector<1x128x128xbf16>
    %83 = vector.shape_cast %82 : vector<1x128x128xbf16> to vector<128x128xbf16>
    %c0_111 = arith.constant 0 : index
    %c0_112 = arith.constant 0 : index
    %c30_113 = arith.constant 30 : index
    %c0_114 = arith.constant 0 : index
    %84 = vector.load %arg3[%c0_111, %c0_112, %c30_113, %c0_114] : memref<1x1x32x128xbf16, #tpu.memory_space<vmem>>, vector<1x1x2x128xbf16>
    %85 = vector.shape_cast %84 : vector<1x1x2x128xbf16> to vector<2x128xbf16>
    %c0_115 = arith.constant 0 : index
    %c0_116 = arith.constant 0 : index
    %86 = vector.load %arg8[%c0_115, %c0_116] : memref<32x128xf32, #tpu.memory_space<vmem>>, vector<2x128xf32>
    %cst_117 = arith.constant dense<0.000000e+00> : vector<2x128xf32>
    %87 = tpu.matmul %85, %83, %cst_117 {dimension_numbers = #tpu.dot_dimension_numbers<[1], [0], [0], [1], [0, 0, 1, 1], [], []>} : vector<2x128xbf16>, vector<128x128xbf16>, vector<2x128xf32> -> vector<2x128xf32>
    %88 = arith.addf %86, %87 : vector<2x128xf32>
    %c0_118 = arith.constant 0 : index
    %c0_119 = arith.constant 0 : index
    %89 = vector.load %arg8[%c0_118, %c0_119] : memref<32x128xf32, #tpu.memory_space<vmem>>, vector<2x128xf32>
    tpu.vector_store %arg8[%c0_118, %c0_119], %88 {strides = array<i32>} : memref<32x128xf32, #tpu.memory_space<vmem>>, vector<2x128xf32>,
    %c0_120 = arith.constant 0 : index
    %c0_121 = arith.constant 0 : index
    %c0_122 = arith.constant 0 : index
    %c0_123 = arith.constant 0 : index
    %90 = vector.load %arg4[%c0_120, %c0_121, %c0_122, %c0_123] : memref<1x1x32x128xbf16, #tpu.memory_space<vmem>>, vector<1x1x30x128xbf16>
    %91 = vector.shape_cast %90 : vector<1x1x30x128xbf16> to vector<30x128xbf16>
    %c2_124 = arith.constant 2 : index
    %c0_125 = arith.constant 0 : index
    %92 = vector.load %arg8[%c2_124, %c0_125] : memref<32x128xf32, #tpu.memory_space<vmem>>, vector<30x128xf32>
    %cst_126 = arith.constant dense<0.000000e+00> : vector<30x128xf32>
    %93 = tpu.matmul %91, %83, %cst_126 {dimension_numbers = #tpu.dot_dimension_numbers<[1], [0], [0], [1], [0, 0, 1, 1], [], []>} : vector<30x128xbf16>, vector<128x128xbf16>, vector<30x128xf32> -> vector<30x128xf32>
    %94 = arith.addf %92, %93 : vector<30x128xf32>
    %c2_127 = arith.constant 2 : index
    %c0_128 = arith.constant 0 : index
    %95 = vector.load %arg8[%c2_127, %c0_128] : memref<32x128xf32, #tpu.memory_space<vmem>>, vector<30x128xf32>
    tpu.vector_store %arg8[%c2_127, %c0_128], %94 {strides = array<i32>} : memref<32x128xf32, #tpu.memory_space<vmem>>, vector<30x128xf32>,
    %c7 = arith.constant 7 : index
    %c0_129 = arith.constant 0 : index
    %c0_130 = arith.constant 0 : index
    %96 = vector.load %arg5[%c7, %c0_129, %c0_130] : memref<9x128x128xbf16, #tpu.memory_space<vmem>>, vector<1x128x128xbf16>
    %97 = vector.shape_cast %96 : vector<1x128x128xbf16> to vector<128x128xbf16>
    %c0_131 = arith.constant 0 : index
    %c0_132 = arith.constant 0 : index
    %c31_133 = arith.constant 31 : index
    %c0_134 = arith.constant 0 : index
    %98 = vector.load %arg3[%c0_131, %c0_132, %c31_133, %c0_134] : memref<1x1x32x128xbf16, #tpu.memory_space<vmem>>, vector<1x1x1x128xbf16>
    %99 = vector.shape_cast %98 : vector<1x1x1x128xbf16> to vector<1x128xbf16>
    %c0_135 = arith.constant 0 : index
    %c0_136 = arith.constant 0 : index
    %100 = vector.load %arg8[%c0_135, %c0_136] : memref<32x128xf32, #tpu.memory_space<vmem>>, vector<1x128xf32>
    %cst_137 = arith.constant dense<0.000000e+00> : vector<1x128xf32>
    %101 = tpu.matmul %99, %97, %cst_137 {dimension_numbers = #tpu.dot_dimension_numbers<[1], [0], [0], [1], [0, 0, 1, 1], [], []>} : vector<1x128xbf16>, vector<128x128xbf16>, vector<1x128xf32> -> vector<1x128xf32>
    %102 = arith.addf %100, %101 : vector<1x128xf32>
    %c0_138 = arith.constant 0 : index
    %c0_139 = arith.constant 0 : index
    %103 = vector.load %arg8[%c0_138, %c0_139] : memref<32x128xf32, #tpu.memory_space<vmem>>, vector<1x128xf32>
    tpu.vector_store %arg8[%c0_138, %c0_139], %102 {strides = array<i32>} : memref<32x128xf32, #tpu.memory_space<vmem>>, vector<1x128xf32>,
    %c0_140 = arith.constant 0 : index
    %c0_141 = arith.constant 0 : index
    %c0_142 = arith.constant 0 : index
    %c0_143 = arith.constant 0 : index
    %104 = vector.load %arg4[%c0_140, %c0_141, %c0_142, %c0_143] : memref<1x1x32x128xbf16, #tpu.memory_space<vmem>>, vector<1x1x31x128xbf16>
    %105 = vector.shape_cast %104 : vector<1x1x31x128xbf16> to vector<31x128xbf16>
    %c1_144 = arith.constant 1 : index
    %c0_145 = arith.constant 0 : index
    %106 = vector.load %arg8[%c1_144, %c0_145] : memref<32x128xf32, #tpu.memory_space<vmem>>, vector<31x128xf32>
    %cst_146 = arith.constant dense<0.000000e+00> : vector<31x128xf32>
    %107 = tpu.matmul %105, %97, %cst_146 {dimension_numbers = #tpu.dot_dimension_numbers<[1], [0], [0], [1], [0, 0, 1, 1], [], []>} : vector<31x128xbf16>, vector<128x128xbf16>, vector<31x128xf32> -> vector<31x128xf32>
    %108 = arith.addf %106, %107 : vector<31x128xf32>
    %c1_147 = arith.constant 1 : index
    %c0_148 = arith.constant 0 : index
    %109 = vector.load %arg8[%c1_147, %c0_148] : memref<32x128xf32, #tpu.memory_space<vmem>>, vector<31x128xf32>
    tpu.vector_store %arg8[%c1_147, %c0_148], %108 {strides = array<i32>} : memref<32x128xf32, #tpu.memory_space<vmem>>, vector<31x128xf32>,
    %c8 = arith.constant 8 : index
    %c0_149 = arith.constant 0 : index
    %c0_150 = arith.constant 0 : index
    %110 = vector.load %arg5[%c8, %c0_149, %c0_150] : memref<9x128x128xbf16, #tpu.memory_space<vmem>>, vector<1x128x128xbf16>
    %111 = vector.shape_cast %110 : vector<1x128x128xbf16> to vector<128x128xbf16>
    %c0_151 = arith.constant 0 : index
    %c0_152 = arith.constant 0 : index
    %c0_153 = arith.constant 0 : index
    %c0_154 = arith.constant 0 : index
    %112 = vector.load %arg4[%c0_151, %c0_152, %c0_153, %c0_154] : memref<1x1x32x128xbf16, #tpu.memory_space<vmem>>, vector<1x1x32x128xbf16>
    %113 = vector.shape_cast %112 : vector<1x1x32x128xbf16> to vector<32x128xbf16>
    %c0_155 = arith.constant 0 : index
    %c0_156 = arith.constant 0 : index
    %114 = vector.load %arg8[%c0_155, %c0_156] : memref<32x128xf32, #tpu.memory_space<vmem>>, vector<32x128xf32>
    %cst_157 = arith.constant dense<0.000000e+00> : vector<32x128xf32>
    %115 = tpu.matmul %113, %111, %cst_157 {dimension_numbers = #tpu.dot_dimension_numbers<[1], [0], [0], [1], [0, 0, 1, 1], [], []>} : vector<32x128xbf16>, vector<128x128xbf16>, vector<32x128xf32> -> vector<32x128xf32>
    %116 = arith.addf %114, %115 : vector<32x128xf32>
    %c0_158 = arith.constant 0 : index
    %c0_159 = arith.constant 0 : index
    %117 = vector.load %arg8[%c0_158, %c0_159] : memref<32x128xf32, #tpu.memory_space<vmem>>, vector<32x128xf32>
    tpu.vector_store %arg8[%c0_158, %c0_159], %116 {strides = array<i32>} : memref<32x128xf32, #tpu.memory_space<vmem>>, vector<32x128xf32>,
    %c0_160 = arith.constant 0 : index
    %c0_161 = arith.constant 0 : index
    %118 = vector.load %arg8[%c0_160, %c0_161] : memref<32x128xf32, #tpu.memory_space<vmem>>, vector<32x128xf32>
    %cst_162 = arith.constant 0.000000e+00 : f32
    %119 = vector.broadcast %cst_162 : f32 to vector<32x128xf32>
    %120 = arith.maximumf %118, %119 : vector<32x128xf32>
    %c0_163 = arith.constant 0 : index
    %c0_164 = arith.constant 0 : index
    %c0_165 = arith.constant 0 : index
    %121 = vector.load %arg7[%c0_163, %c0_164, %c0_165] : memref<1x32x128xf32, #tpu.memory_space<vmem>>, vector<1x32x128xf32>
    %122 = vector.shape_cast %121 : vector<1x32x128xf32> to vector<32x128xf32>
    %123 = vector.shape_cast %120 : vector<32x128xf32> to vector<1x32x128xf32>
    tpu.vector_store %arg7[%c0_163, %c0_164, %c0_165], %123 {strides = array<i32>} : memref<1x32x128xf32, #tpu.memory_space<vmem>>, vector<1x32x128xf32>,
    return
  }
  func.func @transform_0(%arg0: i32, %arg1: i32, %arg2: i32) -> (i32, i32, i32, i32) {
    %c0_i32 = arith.constant 0 : i32
    %c0_i32_0 = arith.constant 0 : i32
    %c0_i32_1 = arith.constant 0 : i32
    return %arg0, %c0_i32, %arg1, %c0_i32_0 : i32, i32, i32, i32
  }
  func.func @transform_1(%arg0: i32, %arg1: i32, %arg2: i32) -> (i32, i32, i32, i32) {
    %c1_i32 = arith.constant 1 : i32
    %0 = arith.addi %arg1, %c1_i32 : i32
    %c1_i32_0 = arith.constant 1 : i32
    %1 = arith.muli %0, %c1_i32_0 : i32
    %c0_i32 = arith.constant 0 : i32
    %c0_i32_1 = arith.constant 0 : i32
    %c0_i32_2 = arith.constant 0 : i32
    return %arg0, %c0_i32, %1, %c0_i32_1 : i32, i32, i32, i32
  }
  func.func @transform_2(%arg0: i32, %arg1: i32, %arg2: i32) -> (i32, i32, i32) {
    %c0_i32 = arith.constant 0 : i32
    %c0_i32_0 = arith.constant 0 : i32
    %c0_i32_1 = arith.constant 0 : i32
    return %c0_i32, %c0_i32_0, %arg2 : i32, i32, i32
  }
  func.func @transform_3(%arg0: i32, %arg1: i32, %arg2: i32) -> (i32, i32) {
    %c0_i32 = arith.constant 0 : i32
    %c0_i32_0 = arith.constant 0 : i32
    return %c0_i32, %arg2 : i32, i32
  }
  func.func @transform_4(%arg0: i32, %arg1: i32, %arg2: i32) -> (i32, i32, i32) {
    %c0_i32 = arith.constant 0 : i32
    return %arg0, %arg1, %arg2 : i32, i32, i32
  }
}

</mosaic_0001>

<bundles_post_ra>
// kernel: tpu_custom_call.1
= control target key start
LH: loop header
LB: loop body
LE: loop exit
PB: predicated region body
PF: predicated region fallthrough
CT: control target
= control target key end

     0   :  { %s3765_s0 = inlined_call_operand.hbm [shape: bf16[2,1,320,128], index: 0, kind: input, shape index: {}]   ;;  %s3766_s1 = inlined_call_operand.hbm [shape: bf16[2,1,320,128], index: 1, kind: input, shape index: {}]   ;;  %s3767_s2 = inlined_call_operand.hbm [shape: bf16[9,128,128], index: 2, kind: input, shape index: {}]   ;;  %s3768_s3 = inlined_call_operand.vmem [shape: f32[1,128], index: 3, kind: input, shape index: {}]   ;;  %s3769_s4 = inlined_call_operand.hbm [shape: f32[2,288,128], index: 4, kind: output, shape index: {}]  }
   0x1   :  { %3786 = sst [smem:[#allocation20_spill]] %s3765_s0 }
   0x2   :  { %3787 = sst [smem:[#allocation21_spill]] %s3767_s2 }
   0x3   :  { %3788 = sst [smem:[#allocation22_spill]] %s3768_s3 }
   0x4   :  { %3789 = sst [smem:[#allocation23_spill]] %s3769_s4 }
   0x5   :  { %9 = vsyncpa [#allocation4], 0 }
   0x6   :  { %11 = vsyncpa [#allocation4 + $0x1], 0 }
   0x7   :  { %12 = vsyncpa [#allocation7], 0 }
   0x8   :  { %14 = vsyncpa [#allocation7 + $0x1], 0 }
   0x9   :  { %15 = vsyncpa [#allocation5], 0 }
   0xa   :  { %17 = vsyncpa [#allocation5 + $0x1], 0  ;;  %s3219_s15 = smov 0   ;;  %s3221_s16 = smov 0  }
   0xb   :  { %s3223_s17 = smov 0   ;;  %s3225_s18 = smov 0  }
   0xc   :  { %s3227_s19 = smov 0   ;;  %s3229_s20 = smov 0  }
   0xd   :  { %s3231_s21 = smov 0   ;;  %s3233_s22 = smov 0  }
   0xe   :  { %s3235_s23 = smov 0   ;;  %s3237_s24 = smov 0  }
   0xf   :  { %s3239_s25 = smov 0  }
  0x10 LB: > { %3790 = sst [smem:[#allocation14_spill]] %s3154_s18  ;;  %s3273_s26 = sadd.s32 4294967295, %s3182_s25   ;;  %s3182_s25 = sphi %s3239_s25, %s23_s25   ;;  %s3178_s24 = sphi %s3237_s24, %s3837_s24   ;;  %s3174_s23 = sphi %s3235_s23, %s3836_s23   ;;  %s3170_s22 = sphi %s3233_s22, %s3835_s22   ;;  %s3166_s21 = sphi %s3231_s21, %s3834_s21   ;;  %s3162_s20 = sphi %s3229_s20, %s3833_s20   ;;  %s3158_s19 = sphi %s3227_s19, %s3832_s19   ;;  %s3154_s18 = sphi %s3225_s18, %s3831_s18   ;;  %s3150_s17 = sphi %s3223_s17, %s3830_s17   ;;  %s3146_s16 = sphi %s3221_s16, %s3829_s16   ;;  %s3142_s15 = sphi %s3219_s15, %s3828_s15  }
  0x11   : > { %3791 = sst [smem:[#allocation15_spill]] %s3166_s21  ;;  %s2155_s27 = sadd.s32 4294967294, %s3182_s25  }
  0x12   : > { %3792 = sst [smem:[#allocation16_spill]] %s3170_s22  ;;  %p64_p0 = scmp.ne.s32.totalorder %s3158_s19, %s3154_s18 }
  0x13   : > { %p3770_p1 = scmp.eq.s32.totalorder %s3273_s26, 0  ;;  %p94_p2 = scmp.ne.s32.totalorder %s3146_s16, %s3142_s15 }
  0x14   : > { %p180_p4 = scmp.eq.s32.totalorder %s2155_s27, 17  ;;  %p2156_p6 = scmp.ge.s32.totalorder %s3182_s25, 1 }
  0x15   : > { %p3282_p3 = por %p3770_p1, %p64_p0  ;;  %p3288_p5 = por %p94_p2, %p3770_p1 }
  0x16   : > { %p3293_p7 = por %p180_p4, %p64_p0  ;;  %p187_p8 = scmp.lt.s32.totalorder %s3182_s25, 19 }
  0x17   : > { %s3793_s28 = scalar_select %p3282_p3, 1, 0 }
  0x18   : > { %s3794_s29 = scalar_select %p3288_p5, 1, 0 }
  0x19   : > { %s3795_s30 = scalar_select %p3293_p7, 1, 0 }
  0x1a   : > { %p3298_p9 = pnand %p2156_p6, %p187_p8  ;;  %s3184_s6 = smov [#allocation8]  }
  0x1b   : > { %3796 = sst [smem:[#allocation17_spill]] %s3795_s30  ;;  %s201_s7 = sshll.u32 %s3184_s6, 4  ;;  %s202_s7 = int_to_ptr.vmem [resolvable:$true] %s201_s7 }
  0x1c   : > { %s3797_s5 = scalar_select %p3298_p9, 1, 0 }
  0x1d   : > { %p2755_p10 = pneg %p3298_p9  ;;  %s3799_s2 = sld [smem:[#allocation21_spill]] }
  0x1f   : > { %p3306_p11 = pnand %p2755_p10, %p3770_p1 }
  0x21   : > { %p2965_p13 = pneg %p3306_p11 }
  0x23   : > { %s2963_s11 = scalar_lea.hbm %s3799_s2, 9216 }
  0x24   : > { %p2964_p12 = scmp.ne.s32.totalorder %s3799_s2, %s2963_s11  ;;  %p2970_p4 = scmp.lt.u32.totalorder %s2963_s11, %s3799_s2 }
  0x26   : > { %p2966_p0 = pnand %p2965_p13, %p2964_p12 }
  0x28   : > { %p2967_p2 = pneg %p2966_p0 }
  0x2a   : > { %p2972_p6 = pnand %p2970_p4, %p2967_p2 }
  0x2c   : > { %2975 = shalt.err (!%p2972_p6)
}
  0x2d   : > { %s2976_s27 = scalar_lea.vmem %s202_s7, 9216  ;;  %p2984_p7 = scmp.lt.s32.totalorder %s202_s7, %s202_s7 }
  0x2e   : > { %p2977_p8 = scmp.ne.s32.totalorder %s202_s7, %s2976_s27  ;;  %p2985_p5 = scmp.lt.s32.totalorder %s2976_s27, %s2976_s27 }
  0x30   : > { %p2979_p10 = pnand %p2977_p8, %p2965_p13  ;;  %p2986_p3 = por %p2985_p5, %p2984_p7 }
  0x32   : > { %p2980_p1 = pneg %p2979_p10 }
  0x34   : > { %p2987_p9 = pnand %p2986_p3, %p2980_p1 }
  0x36   : > { %2990 = shalt.err (!%p2987_p9)
}
  0x37   : > { %s3774_s6 = smov 64   ;;  %s3776_s9 = smov 4  }
  0x38   : > { %2758 = dma.hbm_to_vmem [thread:$0]  (!%p3306_p11), %s3799_s2, 9216, %s202_s7, [#allocation7], %s3774_s6, %s3774_s6, %s3776_s9  }
  0x39   : > { %s38_s12 = sadd.s32 1, %s3174_s23  ;;  %s42_s13 = sadd.s32 1, %s3178_s24 }
  0x3a   : > { %p40_p1 = scmp.ge.s32.totalorder %s38_s12, 9  ;;  %p174_p3 = scmp.eq.s32.totalorder %s3273_s26, 17 }
  0x3b   : > { %p58_p5 = scmp.ne.s32.totalorder %s3162_s20, %s3158_s19  ;;  %s51_s8 = sadd.s32 1, %s3162_s20 }
  0x3c   : > { %s3334_s14 = scalar_select %p40_p1, 0, %s38_s12  }
  0x3d   : > { %s3839_s13 = smov (!%p40_p1, %s42_s13), %s3178_s24  ;;  %p3783_p7 = scmp.eq.s32.totalorder %s3182_s25, 0 }
  0x3e   : > { %3800 = sst [smem:[#allocation18_spill]] %s3334_s14  ;;  %p44_p9 = scmp.ge.s32.totalorder %s3839_s13, 2 }
  0x3f   : > { %s75_s7 = sadd.s32 1, %s3334_s14  ;;  %s47_s15 = ssub.s32 %s3174_s23, %s3334_s14 }
  0x40   : > { %p3344_p11 = por %p3783_p7, %p58_p5  ;;  %s3841_s13 = smov (%p44_p9, %s3839_s13), 0 }
  0x41   : > { %3802 = sst [smem:[#allocation19_spill]] %s3841_s13  ;;  %s77_s10 = ssub.s32 %s38_s12, %s75_s7 }
  0x42   : > { %p3350_p12 = por %p174_p3, %p58_p5  ;;  %s46_s6 = ssub.s32 %s3178_s24, %s3841_s13 }
  0x43   : > { %s221_s9 = sand.u32 1, %s3162_s20   ;;  %s48_s2 = sor.u32 %s47_s15, %s46_s6 }
  0x44   : > { %s3803_s11 = scalar_select %p3350_p12, 1, 0 }
  0x45   : > { %p3782_p13 = scmp.lt.s32.totalorder %s3182_s25, 18  ;;  %p49_p0 = scmp.eq.s32.totalorder %s48_s2, 0 }
  0x46   : > { %s78_s14 = sor.u32 %s77_s10, %s46_s6  ;;  %s2160_s30 = sshll.u32 %s221_s9, 4 }
  0x47   : > { %s3359_s18 = scalar_select %p49_p0, %s3162_s20, %s51_s8  }
  0x48   : > { %s2161_s4 = sshll.u32 %s3174_s23, 2  ;;  %s2743_s21 = smul.u32 40, %s3178_s24 }
  0x49   : > { %s225_s22 = scalar_lea.vmem [#allocation3], %s2160_s30  ;;  %p3369_p2 = pnand %p3782_p13, %p3344_p11 }
  0x4a   : > { %s234_s3 = sshll.u32 %s225_s22, 4  ;;  %s3373_s7 = sadd.s32 %s2743_s21, %s2161_s4  ;;  %s3363_s3 = int_to_ptr.vmem [resolvable:$true] %s234_s3 }
  0x4b   : > { %s2162_s2 = sshll.u32 %s3373_s7, 6  ;;  %p3376_p4 = scmp.eq.s32.totalorder %s78_s14, 0 }
  0x4c   : > { %s3806_s0 = sld [smem:[#allocation20_spill]]  ;;  %s3387_s15 = scalar_lea.sflag [#allocation4], %s221_s9 }
  0x4d   : > { %p2993_p8 = pneg %p3369_p2 }
  0x52   : > { %s3385_s8 = scalar_lea.hbm %s3806_s0, %s2162_s2  ;;  %s2996_s27 = scalar_lea.hbm %s3806_s0, 5120 }
  0x53   : > { %s2991_s4 = scalar_lea.hbm %s3385_s8, 256  ;;  %p2997_p3 = scmp.lt.u32.totalorder %s3385_s8, %s3806_s0 }
  0x54   : > { %p2992_p6 = scmp.ne.s32.totalorder %s3385_s8, %s2991_s4  ;;  %p2998_p5 = scmp.lt.u32.totalorder %s2996_s27, %s2991_s4 }
  0x55   : > { %p3000_p11 = scmp.lt.u32.totalorder %s2991_s4, %s3385_s8 }
  0x56   : > { %p2994_p10 = pnand %p2993_p8, %p2992_p6  ;;  %p2999_p9 = por %p2998_p5, %p2997_p3 }
  0x58   : > { %p2995_p1 = pneg %p2994_p10  ;;  %p3001_p0 = por %p3000_p11, %p2999_p9 }
  0x5a   : > { %p3002_p13 = pnand %p3001_p0, %p2995_p1 }
  0x5c   : > { %3005 = shalt.err (!%p3002_p13)
}
  0x5d   : > { %s3006_s9 = scalar_lea.vmem %s3363_s3, 256  ;;  %s3187_s30 = smov [#allocation3]  }
  0x5e   : > { %p3007_p6 = scmp.ne.s32.totalorder %s3363_s3, %s3006_s9  ;;  %s3011_s21 = sshll.u32 %s3187_s30, 4  ;;  %s3012_s21 = int_to_ptr.vmem [resolvable:$false] %s3011_s21 }
  0x5f   : > { %s3013_s14 = scalar_lea.vmem %s3012_s21, 512  ;;  %p3014_p12 = scmp.lt.s32.totalorder %s3363_s3, %s3012_s21 }
  0x60   : > { %p3009_p10 = pnand %p3007_p6, %p2993_p8  ;;  %p3015_p3 = scmp.lt.s32.totalorder %s3013_s14, %s3006_s9 }
  0x62   : > { %p3010_p7 = pneg %p3009_p10  ;;  %p3016_p5 = por %p3015_p3, %p3014_p12 }
  0x64   : > { %p3017_p9 = pnand %p3016_p5, %p3010_p7 }
  0x66   : > { %3020 = shalt.err (!%p3017_p9)
}
  0x67   : > { %s3807_s4 = smov 4   ;;  %s3808_s27 = smov 64  }
  0x68   : > { %2762 = dma.hbm_to_vmem [thread:$0]  (!%p3369_p2), %s3385_s8, 256, %s3363_s3, %s3387_s15, %s3808_s27, %s3808_s27, %s3807_s4  }
  0x69   : > { %s2058_s22 = scalar_lea.hbm %s3766_s1, %s2162_s2  ;;  %s81_s9 = sadd.s32 1, %s3150_s17 }
  0x6a   : > { %p88_p7 = scmp.ne.s32.totalorder %s3150_s17, %s3146_s16  ;;  %p3809_p12 = scmp.eq.s32.totalorder %s3182_s25, 0 }
  0x6b   : > { %s3429_s30 = scalar_select %p3376_p4, %s3150_s17, %s81_s9  }
  0x6c   : > { %p90_p13 = por %p88_p7, %p3809_p12  ;;  %s244_s21 = sand.u32 1, %s3182_s25  }
  0x6d   : > { %s3434_s14 = scalar_lea.hbm %s2058_s22, 256  ;;  %s246_s0 = sand.u32 1, %s3150_s17  }
  0x6e   : > { %s2163_s3 = sshll.u32 %s246_s0, 4  ;;  %p3810_p2 = scmp.lt.s32.totalorder %s3182_s25, 18 }
  0x6f   : > { %s248_s2 = scalar_lea.vmem [#allocation6], %s2163_s3  ;;  %s3445_s8 = scalar_lea.sflag [#allocation7], %s244_s21 }
  0x70   : > { %p3439_p8 = pnand %p3810_p2, %p90_p13  ;;  %s258_s6 = sshll.u32 %s248_s2, 4  ;;  %s3443_s6 = int_to_ptr.vmem [resolvable:$true] %s258_s6 }
  0x71   : > { %s3051_s15 = scalar_lea.hbm %s2058_s22, 512  ;;  %s3026_s12 = scalar_lea.hbm %s3766_s1, 5120 }
  0x72   : > { %p3022_p4 = scmp.ne.s32.totalorder %s3434_s14, %s3051_s15  ;;  %p3023_p1 = pneg %p3439_p8 }
  0x73   : > { %p3027_p6 = scmp.lt.u32.totalorder %s3434_s14, %s3766_s1  ;;  %p3028_p10 = scmp.lt.u32.totalorder %s3026_s12, %s3051_s15 }
  0x74   : > { %p3024_p11 = pnand %p3023_p1, %p3022_p4  ;;  %p3030_p5 = scmp.lt.u32.totalorder %s3051_s15, %s3434_s14 }
  0x75   : > { %p3029_p3 = por %p3028_p10, %p3027_p6 }
  0x76   : > { %p3025_p0 = pneg %p3024_p11 }
  0x77   : > { %p3031_p9 = por %p3030_p5, %p3029_p3 }
  0x79   : > { %p3032_p7 = pnand %p3031_p9, %p3025_p0 }
  0x7b   : > { %3035 = shalt.err (!%p3032_p7)
}
  0x7c   : > { %s3036_s22 = scalar_lea.vmem %s3443_s6, 256  ;;  %s3188_s21 = smov [#allocation6]  }
  0x7d   : > { %p3037_p12 = scmp.ne.s32.totalorder %s3443_s6, %s3036_s22  ;;  %s3041_s3 = sshll.u32 %s3188_s21, 4  ;;  %s3042_s3 = int_to_ptr.vmem [resolvable:$false] %s3041_s3 }
  0x7e   : > { %s3043_s13 = scalar_lea.vmem %s3042_s3, 512  ;;  %p3044_p4 = scmp.lt.s32.totalorder %s3443_s6, %s3042_s3 }
  0x7f   : > { %p3039_p13 = pnand %p3037_p12, %p3023_p1  ;;  %p3045_p11 = scmp.lt.s32.totalorder %s3043_s13, %s3036_s22 }
  0x81   : > { %p3040_p2 = pneg %p3039_p13  ;;  %p3046_p6 = por %p3045_p11, %p3044_p4 }
  0x83   : > { %p3047_p10 = pnand %p3046_p6, %p3040_p2 }
  0x85   : > { %3050 = shalt.err (!%p3047_p10)
}
  0x86   : > { %2765 = dma.hbm_to_vmem [thread:$0]  (!%p3439_p8), %s3434_s14, 256, %s3443_s6, %s3445_s8, %s3808_s27, %s3808_s27, %s3807_s4  }
  0x87   : > { %p3812_p1 = scmp.ne.s32.totalorder %s3797_s5, 0 }
  0x88   : > { %s3478_s2 = sand.u32 (!%p3812_p1), 1, %s3158_s19   ;;  %p3813_p0 = scmp.ne.s32.totalorder (!%p3812_p1), %s3793_s28, 0 }
  0x89   : > { %270 = sbr.rel (%p3812_p1) target bundleno = 654 (0x28e), region = 36  ;;  %s2167_s15 = sshll.u32 (!%p3812_p1), %s3478_s2, 4 }
  0x8a   : > { %s273_s0 = scalar_lea.sflag (!%p3812_p1), [#allocation4], %s3478_s2  ;;  %s3482_s10 = scalar_lea.vmem (!%p3812_p1), [#allocation3], %s2167_s15 }
  0x90   : > { %3125 = dma.done.wait (%p3813_p0), %s273_s0, 256  }
  0x91   : > { %3127 = vsyncadd (%p3813_p0), %s273_s0, 4294967040  ;;  %s281_s5 = sand.u32 1, %s3273_s26   ;;  %s283_s4 = sand.u32 1, %s3146_s16  }
  0x92   : > { %s2168_s27 = sshll.u32 %s283_s4, 4  ;;  %s282_s14 = scalar_lea.sflag [#allocation7], %s281_s5 }
  0x93   : > { %s3490_s7 = scalar_lea.vmem [#allocation6], %s2168_s27  ;;  %p3814_p8 = scmp.ne.s32.totalorder %s3794_s29, 0 }
  0x95   : > { %3129 = dma.done.wait (%p3814_p8), %s282_s14, 256  }
  0x96   : > { %3131 = vsyncadd (%p3814_p8), %s282_s14, 4294967040  ;;  %p3815_p3 = scmp.eq.s32.totalorder %s3273_s26, 0 }
  0x98   : > { %3133 = dma.done.wait (%p3815_p3), [#allocation7], 9216   ;;  %p3816_p5 = pmov %p3815_p3 }
  0x99   : > { %v2869_v0 = vld [vmem:[#allocation8] sm:$0xff]   ;;  %v2871_v2 = vld [vmem:[#allocation8 + $0x8] sm:$0xff]   ;;  %v2873_v4 = vld [vmem:[#allocation8 + $0x10] sm:$0xff]   ;;  %vm517_vm0 = vsmask.f32 7424  ;;  %vm719_vm1 = vcmask 1046528  }
  0x9a   : > { %3135 = vsyncadd (%p3816_p5), [#allocation7], 4294958080  ;;  %v3500_v1 = vld [vmem:[#allocation8 + $0x40] sm:$0xff]   ;;  %2423 = vmatprep.subr.bf16.mxu0 %v2869_v0  ;;  %v3503_v3 = vld [vmem:[#allocation8 + $0x48] sm:$0xff]   ;;  %v3189_v32 = vmov 0.0   ;;  %vm3190_vm2 = vmmov 0  }
  0x9b   : > { %2443 = vmatprep.subr.bf16.mxu1 %v3500_v1  ;;  %2424 = vmatpush3.bf16.msra.mxu0 %v2869_v0  ;;  %v3507_v5 = vld [vmem:[#allocation8 + $0x50] sm:$0xff]   ;;  %v2875_v6 = vld [vmem:[#allocation8 + $0x18] sm:$0xff]   ;;  %v2877_v8 = vld [vmem:[#allocation8 + $0x20] sm:$0xff]   ;;  %vm905_vm3 = vsmask.f32 4352  ;;  %s3817_s29 = sld [smem:[#allocation22_spill]] }
  0x9c   : > { %2444 = vmatpush3.bf16.msra.mxu1 %v3500_v1  ;;  %2425 = vmatprep.subr.bf16.mxu0 %v2871_v2  ;;  %v3511_v7 = vld [vmem:[#allocation8 + $0x58] sm:$0xff]   ;;  %v3515_v9 = vld [vmem:[#allocation8 + $0x60] sm:$0xff]   ;;  %v2879_v10 = vld [vmem:[#allocation8 + $0x28] sm:$0xff]   ;;  %s3818_s6 = sld [smem:[#allocation16_spill]]  ;;  %s3819_s8 = sld [smem:[#allocation15_spill]] }
  0x9d   : > { %2445 = vmatprep.subr.bf16.mxu1 %v3503_v3  ;;  %v2885_v11 = vld [vmem:[%s3482_s10] sm:$0xff]   ;;  %v3520_v12 = vld [vmem:[#allocation8 + $0x68] sm:$0xff]   ;;  %v2883_v20 = vld [vmem:[#allocation8 + $0x38] sm:$0xff]   ;;  %s2170_s9 = sshll.u32 %s3478_s2, 5  ;;  %s3820_s5 = sld [smem:[#allocation23_spill]] }
  0x9e   : > { %2439 = vmatprep.mubr.bf16.mxu0 %v2885_v11  ;;  %v2887_v13 = vld [vmem:[%s3482_s10] sm:$0xff]   ;;  %v2888_v14 = vld [vmem:[%s3482_s10 + $0x8] sm:$0xff]   ;;  %s321_s13 = scalar_lea.vmem [#allocation9], %s2170_s9  ;;  %s1994_s27 = scalar_lea.sflag [#allocation5], %s3478_s2 }
  0x9f   : > { %2426 = vmatpush3.bf16.msra.mxu0 %v2871_v2  ;;  %v2881_v15 = vld [vmem:[#allocation8 + $0x30] sm:$0xff]   ;;  %v519_v17 = vshrl.u32 %v2887_v13, 16  ;;  %v521_v18 = vshll.u32 %v2887_v13, 16  ;;  %v526_v19 = vshll.u32 %v2888_v14, 16  ;;  %v3530_v23 = vld [vmem:[#allocation8 + $0x78] sm:$0xff]   ;;  %v530_v26 = vshrl.u32 %v2888_v14, 16 }
  0xa0   : > { %2446 = vmatpush3.bf16.msra.mxu1 %v3503_v3  ;;  %2427 = vmatprep.subr.bf16.mxu0 %v2873_v4  ;;  %v3526_v16 = vld [vmem:[#allocation8 + $0x70] sm:$0xff]   ;;  %v3533_v27 = vld [vmem:[#allocation8 + $0x80] sm:$0xff]   ;;  %v2886_v28 = vld [vmem:[%s3482_s10 + $0x8] sm:$0xff]   ;;  %s2010_s15 = sshll.u32 %s321_s13, 4  ;;  %p3821_p7 = scmp.ne.s32.totalorder %s3803_s11, 0  ;;  %s3702_s15 = int_to_ptr.vmem [resolvable:$true] %s2010_s15 }
  0xa1   : > { %2447 = vmatprep.subr.bf16.mxu1 %v3507_v5  ;;  %v523_v21 = vrot.slane %v521_v18, 1  ;;  %v528_v22 = vrot.slane %v526_v19, 1  ;;  %v2897_v29 = vld [vmem:[%s3482_s10] sm:$0xfe]   ;;  %v3539_v30 = vld [vmem:[%s3482_s10 + $0x8] sm:$0xff]   ;;  %s3052_s14 = scalar_lea.vmem %s3702_s15, 512 }
  0xa2   : > { %v720_v33 = vrot.slane %v2897_v29, 1  ;;  %v721_v34 = vrot.slane %v3539_v30, 1  ;;  %v3545_v35 = vld [vmem:[#allocation8 + $0x88] sm:$0xff]   ;;  %v3553_v37 = vld [vmem:[#allocation8 + $0x90] sm:$0xff]   ;;  %v3561_v38 = vld [vmem:[#allocation8 + $0x98] sm:$0xff]   ;;  %s2744_s12 = smul.u32 36, %s3818_s6  ;;  %p3053_p9 = scmp.ne.s32.totalorder %s3702_s15, %s3052_s14 }
  0xa3   : > { %2428 = vmatpush3.bf16.msra.mxu0 %v2873_v4  ;;  %v524_v24 = vor.u32 %v523_v21, %v519_v17  ;;  %v532_v31 = vor.u32 %v530_v26, %v528_v22  ;;  %v3567_v39 = vld [vmem:[#allocation8 + $0xa0] sm:$0xff]   ;;  %v3573_v40 = vld [vmem:[#allocation8 + $0xa8] sm:$0xff]   ;;  %v2895_v43 = vld [vmem:[#allocation8 + $0xb0] sm:$0xff]   ;;  %s2267_s22 = sshll.u32 %s3819_s8, 2 }
  0xa4   : > { %2448 = vmatpush3.bf16.msra.mxu1 %v3507_v5  ;;  %2429 = vmatprep.subr.bf16.mxu0 %v2875_v6  ;;  %v722_v36 = vsel %vm719_vm1, %v720_v33, %v721_v34  ;;  %v2907_v41 = vld [vmem:[%s3482_s10 + $0x4] sm:$0xf8]   ;;  %v2908_v42 = vld [vmem:[%s3482_s10 + $0xc] ss:$0 sps:$4 sm:$0xff]   ;;  %v640_v54 = vld [vmem:[%s3490_s7] sm:$0x1]  ;;  %s2007_s21 = sadd.s32 %s2744_s12, %s2267_s22  ;;  %p3054_p12 = pnand %p3053_p9, %p3821_p7 }
  0xa5   : > { %2449 = vmatprep.subr.bf16.mxu1 %v3511_v7  ;;  %v529_v25 = vsel %vm517_vm0, %v524_v24, %v528_v22  ;;  %v907_v44 = vshrl.u32 %v2907_v41, 16  ;;  %v910_v45 = vshll.u32 %v2907_v41, 16  ;;  %v915_v46 = vshrl.u32 %v2908_v42, 16  ;;  %v2896_v48 = vld [vmem:[#allocation8 + $0xb8] sm:$0xff]   ;;  %v2899_v53 = vld [vmem:[#allocation8 + $0xc0] sm:$0xff]   ;;  %v2900_v57 = vld [vmem:[#allocation8 + $0xc8] sm:$0xff]  }
  0xa6   : > { %2459 = vmatprep.mubr.bf16.mxu1 %v529_v25  ;;  %v918_v47 = vshll.u32 %v2908_v42, 16  ;;  %v2901_v59 = vld [vmem:[#allocation8 + $0xd0] sm:$0xff]   ;;  %v2902_v60 = vld [vmem:[#allocation8 + $0xd8] sm:$0xff]   ;;  %v2903_v61 = vld [vmem:[#allocation8 + $0xe0] sm:$0xff]   ;;  %s2268_s3 = sshll.u32 %s2007_s21, 7  ;;  %p3055_p13 = pneg %p3054_p12 }
  0xa7   : > { %2430 = vmatpush3.bf16.msra.mxu0 %v2875_v6  ;;  %v909_v49 = vrot.slane %v907_v44, 3  ;;  %v912_v50 = vrot.slane %v910_v45, 4  ;;  %v917_v51 = vrot.slane %v915_v46, 3  ;;  %v2904_v62 = vld [vmem:[#allocation8 + $0xe8] sm:$0xff]   ;;  %v2905_v63 = vld [vmem:[#allocation8 + $0xf0] sm:$0xff]   ;;  %v2906_v0 = vld [vmem:[#allocation8 + $0xf8] sm:$0xff]   ;;  %s3700_s4 = scalar_lea.hbm %s3820_s5, %s2268_s3 }
  0xa8   : > { %2450 = vmatpush3.bf16.msra.mxu1 %v3511_v7  ;;  %2431 = vmatprep.subr.bf16.mxu0 %v2877_v8  ;;  %v920_v52 = vrot.slane %v918_v47, 4  ;;  %v2909_v2 = vld [vmem:[#allocation8 + $0x100] sm:$0xff]   ;;  %v2911_v4 = vld [vmem:[#allocation8 + $0x110] sm:$0xff]   ;;  %v2918_v11 = vld [vmem:[%s3482_s10 + $0x8] sm:$0xff]  }
  0xa9   : > { %2451 = vmatprep.subr.bf16.mxu1 %v3515_v9  ;;  %v913_v55 = vor.u32 %v912_v50, %v909_v49  ;;  %v2913_v6 = vld [vmem:[#allocation8 + $0x120] sm:$0xff]   ;;  %v2920_v13 = vld [vmem:[#allocation8 + $0x148] sm:$0xff]   ;;  %v2921_v14 = vld [vmem:[#allocation8 + $0x150] sm:$0xff]  }
  0xaa   : > { %v921_v56 = vor.u32 %v920_v52, %v917_v51  ;;  %v2928_v17 = vld [vmem:[%s3482_s10 + $0x8] sm:$0xff]   ;;  %v2927_v24 = vld [vmem:[%s3490_s7] sm:$0xff]  }
  0xab   : > { %2432 = vmatpush3.bf16.msra.mxu0 %v2877_v8  ;;  %v2915_v8 = vld [vmem:[#allocation8 + $0x130] sm:$0xff]   ;;  %v2924_v18 = vld [vmem:[#allocation8 + $0x168] sm:$0xff]   ;;  %v1286_v19 = vshll.u32 %v2928_v17, 16  ;;  %v1284_v21 = vshrl.u32 %v2928_v17, 16  ;;  %v2929_v26 = vld [vmem:[#allocation8 + $0x180] sm:$0xff]  }
  0xac   : > { %2452 = vmatpush3.bf16.msra.mxu1 %v3515_v9  ;;  %2433 = vmatprep.subr.bf16.mxu0 %v2879_v10  ;;  %v922_v58 = vsel %vm905_vm3, %v913_v55, %v921_v56  ;;  %v2931_v29 = vld [vmem:[#allocation8 + $0x190] sm:$0xff]   ;;  %v2932_v30 = vld [vmem:[#allocation8 + $0x198] sm:$0xff]   ;;  %v2934_v33 = vld [vmem:[#allocation8 + $0x1a8] sm:$0xff]  }
  0xad   : > { %2453 = vmatprep.subr.bf16.mxu1 %v3520_v12  ;;  %v1288_v22 = vrot.slane %v1286_v19, 1  ;;  %v2941_v41 = vld [vmem:[#allocation8 + $0x1c8] sm:$0xff]   ;;  %v2942_v42 = vld [vmem:[#allocation8 + $0x1d0] sm:$0xff]   ;;  %v2944_v44 = vld [vmem:[#allocation8 + $0x1e0] sm:$0xff]  }
  0xae   : > { %v2945_v45 = vld [vmem:[#allocation8 + $0x1e8] sm:$0xff]   ;;  %v3674_v47 = vld [vmem:[#allocation8 + $0x1f0] sm:$0xff]   ;;  %v3678_v49 = vld [vmem:[#allocation8 + $0x1f8] sm:$0xff]  }
  0xaf   : > { %2434 = vmatpush3.bf16.msra.mxu0 %v2879_v10  ;;  %v2917_v10 = vld [vmem:[%s3490_s7] sm:$0xff]   ;;  %v1289_v25 = vor.u32 %v1288_v22, %v1284_v21  ;;  %v2950_v46 = vld [vmem:[%s3482_s10 + $0xc] ss:$0 sps:$4 sm:$0x88]  }
  0xb0   : > { %2454 = vmatpush3.bf16.msra.mxu1 %v3520_v12  ;;  %2435 = vmatprep.subr.bf16.mxu0 %v2881_v15  ;;  %v2951_v50 = vld [vmem:[#allocation8 + $0x200] sm:$0xff]   ;;  %v2953_v56 = vld [vmem:[#allocation8 + $0x210] sm:$0xff]  }
  0xb1   : > { %2455 = vmatprep.subr.bf16.mxu1 %v3526_v16  ;;  %v2961_v55 = vld [vmem:[%s3490_s7] sm:$0xff]  }
  0xb3   : > { %2436 = vmatpush3.bf16.msra.mxu0 %v2881_v15  ;;  %v2922_v15 = vld [vmem:[#allocation8 + $0x158] sm:$0xff]  }
  0xb4   : > { %2456 = vmatpush3.bf16.msra.mxu1 %v3526_v16  ;;  %2437 = vmatprep.subr.bf16.mxu0 %v2883_v20 }
  0xb5   : > { %2457 = vmatprep.subr.bf16.mxu1 %v3530_v23 }
  0xb7   : > { %2438 = vmatpush3.bf16.msra.mxu0 %v2883_v20  ;;  %v2925_v20 = vld [vmem:[#allocation8 + $0x170] sm:$0xff]  }
  0xb8   : > { %2458 = vmatpush3.bf16.msra.mxu1 %v3530_v23  ;;  %2463 = vmatprep.subr.bf16.mxu0 %v3189_v32 }
  0xb9   : > { %2483 = vmatprep.subr.bf16.mxu1 %v3533_v27 }
  0xba   : > { %2440 = vmatmul.mubr.bf16.vlgmr.msra.gmra.mrb[0].mxu0 %v2886_v28  ;;  %v2930_v28 = vld [vmem:[#allocation8 + $0x188] sm:$0xff]  }
  0xbb   : > { %2460 = vmatmul.mubr.bf16.vlgmr.msra.gmra.mrb[0].mxu1 %v532_v31  ;;  %2464 = vmatpush3.bf16.msra.mxu0 %v3500_v1  ;;  %v830_v1 = vld [vmem:[%s3490_s7] sm:$0x1] }
  0xbc   : > { %2484 = vmatpush3.bf16.msra.mxu1 %v3533_v27  ;;  %2465 = vmatprep.subr.bf16.mxu0 %v3189_v32  ;;  %v2933_v31 = vld [vmem:[#allocation8 + $0x1a0] sm:$0xff]  }
  0xbd   : > { %2485 = vmatprep.subr.bf16.mxu1 %v3545_v35  ;;  %2479 = vmatprep.mubr.msk.bf16.mxu0 %vm3190_vm2, %v3189_v32 }
  0xbe   : > { %2499 = vmatprep.mubr.bf16.mxu1 %v722_v36  ;;  %v2936_v36 = vld [vmem:[#allocation8 + $0x1b8] sm:$0xff]  }
  0xbf   : > { %2466 = vmatpush3.bf16.msra.mxu0 %v3503_v3  ;;  %v2910_v3 = vld [vmem:[#allocation8 + $0x108] sm:$0xff]  }
  0xc0   : > { %2486 = vmatpush3.bf16.msra.mxu1 %v3545_v35  ;;  %2467 = vmatprep.subr.bf16.mxu0 %v3189_v32 }
  0xc1   : > { %2487 = vmatprep.subr.bf16.mxu1 %v3553_v37 }
  0xc3   : > { %2468 = vmatpush3.bf16.msra.mxu0 %v3507_v5  ;;  %v2912_v5 = vld [vmem:[#allocation8 + $0x118] sm:$0xff]  }
  0xc4   : > { %2488 = vmatpush3.bf16.msra.mxu1 %v3553_v37  ;;  %2469 = vmatprep.subr.bf16.mxu0 %v3189_v32 }
  0xc5   : > { %2489 = vmatprep.subr.bf16.mxu1 %v3561_v38 }
  0xc7   : > { %2470 = vmatpush3.bf16.msra.mxu0 %v3511_v7  ;;  %v2914_v7 = vld [vmem:[#allocation8 + $0x128] sm:$0xff]  }
  0xc8   : > { %2490 = vmatpush3.bf16.msra.mxu1 %v3561_v38  ;;  %2471 = vmatprep.subr.bf16.mxu0 %v3189_v32 }
  0xc9   : > { %2491 = vmatprep.subr.bf16.mxu1 %v3567_v39 }
  0xcb   : > { %2472 = vmatpush3.bf16.msra.mxu0 %v3515_v9  ;;  %v2916_v9 = vld [vmem:[#allocation8 + $0x138] sm:$0xff]  }
  0xcc   : > { %2492 = vmatpush3.bf16.msra.mxu1 %v3567_v39  ;;  %2473 = vmatprep.subr.bf16.mxu0 %v3189_v32 }
  0xcd   : > { %2493 = vmatprep.subr.bf16.mxu1 %v3573_v40 }
  0xcf   : > { %2474 = vmatpush3.bf16.msra.mxu0 %v3520_v12  ;;  %v2919_v12 = vld [vmem:[#allocation8 + $0x140] sm:$0xff]  }
  0xd0   : > { %2494 = vmatpush3.bf16.msra.mxu1 %v3573_v40  ;;  %2475 = vmatprep.subr.bf16.mxu0 %v3189_v32 }
  0xd1   : > { %2495 = vmatprep.subr.bf16.mxu1 %v2895_v43 }
  0xd3   : > { %2476 = vmatpush3.bf16.msra.mxu0 %v3526_v16  ;;  %v2923_v16 = vld [vmem:[#allocation8 + $0x160] sm:$0xff]  }
  0xd4   : > { %2496 = vmatpush3.bf16.msra.mxu1 %v2895_v43  ;;  %2477 = vmatprep.subr.bf16.mxu0 %v3189_v32 }
  0xd5   : > { %2497 = vmatprep.subr.bf16.mxu1 %v2896_v48 }
  0xd7   : > { %2478 = vmatpush3.bf16.msra.mxu0 %v3530_v23  ;;  %v2926_v23 = vld [vmem:[#allocation8 + $0x178] sm:$0xff]  }
  0xd8   : > { %2498 = vmatpush3.bf16.msra.mxu1 %v2896_v48  ;;  %2503 = vmatprep.subr.bf16.mxu0 %v3189_v32 }
  0xd9   : > { %2523 = vmatprep.subr.bf16.mxu1 %v2899_v53 }
  0xda   : > { %2480 = vmatmul.mubr.bf16.vlgmr.msra.gmra.mrb[4].mxu0 %v640_v54  ;;  %v2957_v54 = vld [vmem:[%s3490_s7] sm:$0xff]  }
  0xdb   : > { %2500 = vmatmul.mubr.bf16.vlgmr.msra.gmra.mrb[4].mxu1 %v721_v34  ;;  %2504 = vmatpush3.bf16.msra.mxu0 %v3533_v27  ;;  %v2937_v27 = vld [vmem:[%s3490_s7] sm:$0xff]  }
  0xdc   : > { %2524 = vmatpush3.bf16.msra.mxu1 %v2899_v53  ;;  %2505 = vmatprep.subr.bf16.mxu0 %v3189_v32  ;;  %v2935_v34 = vld [vmem:[#allocation8 + $0x1b0] sm:$0xff]  }
  0xdd   : > { %2525 = vmatprep.subr.bf16.mxu1 %v2900_v57  ;;  %2519 = vmatprep.mubr.msk.bf16.mxu0 %vm3190_vm2, %v3189_v32 }
  0xde   : > { %2539 = vmatprep.mubr.bf16.mxu1 %v922_v58  ;;  %v2956_v58 = vld [vmem:[#allocation8 + $0x228] sm:$0xff]  }
  0xdf   : > { %2506 = vmatpush3.bf16.msra.mxu0 %v3545_v35  ;;  %v2939_v35 = vld [vmem:[%s3482_s10 + $0xc] ss:$0 sps:$4 sm:$0x88]  }
  0xe0   : > { %2526 = vmatpush3.bf16.msra.mxu1 %v2900_v57  ;;  %2507 = vmatprep.subr.bf16.mxu0 %v3189_v32 }
  0xe1   : > { %2527 = vmatprep.subr.bf16.mxu1 %v2901_v59 }
  0xe3   : > { %2508 = vmatpush3.bf16.msra.mxu0 %v3553_v37  ;;  %v2938_v37 = vld [vmem:[%s3490_s7 + $0x8] ss:$0 sps:$4 sm:$0x11]  }
  0xe4   : > { %2528 = vmatpush3.bf16.msra.mxu1 %v2901_v59  ;;  %2509 = vmatprep.subr.bf16.mxu0 %v3189_v32 }
  0xe5   : > { %2529 = vmatprep.subr.bf16.mxu1 %v2902_v60 }
  0xe7   : > { %2510 = vmatpush3.bf16.msra.mxu0 %v3561_v38  ;;  %v1476_v38 = vrot.slane %v2939_v35, 3 }
  0xe8   : > { %2530 = vmatpush3.bf16.msra.mxu1 %v2902_v60  ;;  %2511 = vmatprep.subr.bf16.mxu0 %v3189_v32 }
  0xe9   : > { %2531 = vmatprep.subr.bf16.mxu1 %v2903_v61 }
  0xeb   : > { %2512 = vmatpush3.bf16.msra.mxu0 %v3567_v39  ;;  %v2940_v39 = vld [vmem:[#allocation8 + $0x1c0] sm:$0xff]  }
  0xec   : > { %2532 = vmatpush3.bf16.msra.mxu1 %v2903_v61  ;;  %2513 = vmatprep.subr.bf16.mxu0 %v3189_v32 }
  0xed   : > { %2533 = vmatprep.subr.bf16.mxu1 %v2904_v62 }
  0xef   : > { %2514 = vmatpush3.bf16.msra.mxu0 %v3573_v40  ;;  %v2948_v40 = vld [vmem:[%s3490_s7] sm:$0xff]  }
  0xf0   : > { %2534 = vmatpush3.bf16.msra.mxu1 %v2904_v62  ;;  %2515 = vmatprep.subr.bf16.mxu0 %v3189_v32 }
  0xf1   : > { %2535 = vmatprep.subr.bf16.mxu1 %v2905_v63 }
  0xf3   : > { %2516 = vmatpush3.bf16.msra.mxu0 %v2895_v43  ;;  %v2943_v43 = vld [vmem:[#allocation8 + $0x1d8] sm:$0xff]  }
  0xf4   : > { %2536 = vmatpush3.bf16.msra.mxu1 %v2905_v63  ;;  %2517 = vmatprep.subr.bf16.mxu0 %v3189_v32 }
  0xf5   : > { %2537 = vmatprep.subr.bf16.mxu1 %v2906_v0 }
  0xf7   : > { %2518 = vmatpush3.bf16.msra.mxu0 %v2896_v48  ;;  %v1668_v48 = vshrl.u32 %v2950_v46, 16 }
  0xf8   : > { %2538 = vmatpush3.bf16.msra.mxu1 %v2906_v0  ;;  %2543 = vmatprep.subr.bf16.mxu0 %v3189_v32 }
  0xf9   : > { %2563 = vmatprep.subr.bf16.mxu1 %v3189_v32  ;;  %v1670_v52 = vrot.slane %v1668_v48, 3 }
  0xfa   : > { %2520 = vmatmul.mubr.bf16.vlgmr.msra.gmra.mrb[8].mxu0 %v830_v1 }
  0xfb   : > { %2540 = vmatmul.mubr.bf16.vlgmr.msra.gmra.mrb[8].mxu1 %v917_v51  ;;  %2544 = vmatpush3.bf16.msra.mxu0 %v2899_v53  ;;  %v2949_v51 = vld [vmem:[%s3490_s7 + $0x8] sm:$0x7f]  }
  0xfc   : > { %2564 = vmatpush3.bf16.msra.mxu1 %v2909_v2  ;;  %2545 = vmatprep.subr.bf16.mxu0 %v3189_v32  ;;  %v2952_v53 = vld [vmem:[#allocation8 + $0x208] sm:$0xff]  }
  0xfd   : > { %2565 = vmatprep.subr.bf16.mxu1 %v3189_v32  ;;  %2559 = vmatprep.mubr.msk.bf16.mxu0 %vm3190_vm2, %v3189_v32 }
  0xfe   : > { %2579 = vmatprep.mubr.msk.bf16.mxu1 %vm3190_vm2, %v3189_v32 }
  0xff   : > { %2546 = vmatpush3.bf16.msra.mxu0 %v2900_v57  ;;  %v2955_v57 = vld [vmem:[#allocation8 + $0x220] sm:$0xff]  }
 0x100   : > { %2566 = vmatpush3.bf16.msra.mxu1 %v2910_v3  ;;  %2547 = vmatprep.subr.bf16.mxu0 %v3189_v32 }
 0x101   : > { %2567 = vmatprep.subr.bf16.mxu1 %v3189_v32 }
 0x103   : > { %2548 = vmatpush3.bf16.msra.mxu0 %v2901_v59  ;;  %v2171_v59 = vld [vmem:[%s3817_s29] ss:$0 sm:$0xff] }
 0x104   : > { %2568 = vmatpush3.bf16.msra.mxu1 %v2911_v4  ;;  %2549 = vmatprep.subr.bf16.mxu0 %v3189_v32 }
 0x105   : > { %2569 = vmatprep.subr.bf16.mxu1 %v3189_v32 }
 0x107   : > { %2550 = vmatpush3.bf16.msra.mxu0 %v2902_v60 }
 0x108   : > { %2570 = vmatpush3.bf16.msra.mxu1 %v2912_v5  ;;  %2551 = vmatprep.subr.bf16.mxu0 %v3189_v32 }
 0x109   : > { %2571 = vmatprep.subr.bf16.mxu1 %v3189_v32 }
 0x10b   : > { %2552 = vmatpush3.bf16.msra.mxu0 %v2903_v61  ;;  %v2958_v61 = vld [vmem:[#allocation8 + $0x230] sm:$0xff]  }
 0x10c   : > { %2572 = vmatpush3.bf16.msra.mxu1 %v2913_v6  ;;  %2553 = vmatprep.subr.bf16.mxu0 %v3189_v32 }
 0x10d   : > { %2573 = vmatprep.subr.bf16.mxu1 %v3189_v32 }
 0x10f   : > { %2554 = vmatpush3.bf16.msra.mxu0 %v2904_v62 }
 0x110   : > { %2574 = vmatpush3.bf16.msra.mxu1 %v2914_v7  ;;  %2555 = vmatprep.subr.bf16.mxu0 %v3189_v32 }
 0x111   : > { %2575 = vmatprep.subr.bf16.mxu1 %v3189_v32 }
 0x113   : > { %2556 = vmatpush3.bf16.msra.mxu0 %v2905_v63 }
 0x114   : > { %2576 = vmatpush3.bf16.msra.mxu1 %v2915_v8  ;;  %2557 = vmatprep.subr.bf16.mxu0 %v3189_v32 }
 0x115   : > { %2577 = vmatprep.subr.bf16.mxu1 %v3189_v32 }
 0x117   : > { %2558 = vmatpush3.bf16.msra.mxu0 %v2906_v0 }
 0x118   : > { %2578 = vmatpush3.bf16.msra.mxu1 %v2916_v9  ;;  %2583 = vmatprep.subr.bf16.mxu0 %v3189_v32 }
 0x119   : > { %2603 = vmatprep.subr.bf16.mxu1 %v3189_v32 }
 0x11a   : > { %2560 = vmatmul.mubr.bf16.vlgmr.msra.gmra.mrb[12].mxu0 %v2917_v10 }
 0x11b   : > { %2580 = vmatmul.mubr.bf16.vlgmr.msra.gmra.mrb[12].mxu1 %v2918_v11  ;;  %2584 = vmatpush3.bf16.msra.mxu0 %v2909_v2  ;;  %v2960_v11 = vld [vmem:[#allocation8 + $0x238] sm:$0xff]  }
 0x11c   : > { %2604 = vmatpush3.bf16.msra.mxu1 %v2919_v12  ;;  %2585 = vmatprep.subr.bf16.mxu0 %v3189_v32 }
 0x11d   : > { %2605 = vmatprep.subr.bf16.mxu1 %v3189_v32  ;;  %2599 = vmatprep.mubr.msk.bf16.mxu0 %vm3190_vm2, %v3189_v32 }
 0x11e   : > { %2619 = vmatprep.mubr.msk.bf16.mxu1 %vm3190_vm2, %v3189_v32 }
 0x11f   : > { %2586 = vmatpush3.bf16.msra.mxu0 %v2910_v3 }
 0x120   : > { %2606 = vmatpush3.bf16.msra.mxu1 %v2920_v13  ;;  %2587 = vmatprep.subr.bf16.mxu0 %v3189_v32 }
 0x121   : > { %2607 = vmatprep.subr.bf16.mxu1 %v3189_v32 }
 0x123   : > { %2588 = vmatpush3.bf16.msra.mxu0 %v2911_v4 }
 0x124   : > { %2608 = vmatpush3.bf16.msra.mxu1 %v2921_v14  ;;  %2589 = vmatprep.subr.bf16.mxu0 %v3189_v32 }
 0x125   : > { %2609 = vmatprep.subr.bf16.mxu1 %v3189_v32 }
 0x127   : > { %2590 = vmatpush3.bf16.msra.mxu0 %v2912_v5 }
 0x128   : > { %2610 = vmatpush3.bf16.msra.mxu1 %v2922_v15  ;;  %2591 = vmatprep.subr.bf16.mxu0 %v3189_v32 }
 0x129   : > { %2611 = vmatprep.subr.bf16.mxu1 %v3189_v32 }
 0x12b   : > { %2592 = vmatpush3.bf16.msra.mxu0 %v2913_v6 }
 0x12c   : > { %2612 = vmatpush3.bf16.msra.mxu1 %v2923_v16  ;;  %2593 = vmatprep.subr.bf16.mxu0 %v3189_v32 }
 0x12d   : > { %2613 = vmatprep.subr.bf16.mxu1 %v3189_v32 }
 0x12f   : > { %2594 = vmatpush3.bf16.msra.mxu0 %v2914_v7 }
 0x130   : > { %2614 = vmatpush3.bf16.msra.mxu1 %v2924_v18  ;;  %2595 = vmatprep.subr.bf16.mxu0 %v3189_v32 }
 0x131   : > { %2615 = vmatprep.subr.bf16.mxu1 %v3189_v32 }
 0x133   : > { %2596 = vmatpush3.bf16.msra.mxu0 %v2915_v8 }
 0x134   : > { %2616 = vmatpush3.bf16.msra.mxu1 %v2925_v20  ;;  %2597 = vmatprep.subr.bf16.mxu0 %v3189_v32 }
 0x135   : > { %2617 = vmatprep.subr.bf16.mxu1 %v3189_v32 }
 0x137   : > { %2598 = vmatpush3.bf16.msra.mxu0 %v2916_v9 }
 0x138   : > { %2618 = vmatpush3.bf16.msra.mxu1 %v2926_v23  ;;  %2623 = vmatprep.subr.bf16.mxu0 %v2919_v12 }
 0x139   : > { %2643 = vmatprep.subr.bf16.mxu1 %v3189_v32 }
 0x13a   : > { %2600 = vmatmul.mubr.bf16.vlgmr.msra.gmra.mrb[16].mxu0 %v2927_v24 }
 0x13b   : > { %2620 = vmatmul.mubr.bf16.vlgmr.msra.gmra.mrb[16].mxu1 %v1289_v25  ;;  %2624 = vmatpush3.bf16.msra.mxu0 %v2919_v12 }
 0x13c   : > { %2644 = vmatpush3.bf16.msra.mxu1 %v2929_v26  ;;  %2625 = vmatprep.subr.bf16.mxu0 %v2920_v13 }
 0x13d   : > { %2645 = vmatprep.subr.bf16.mxu1 %v3189_v32  ;;  %2639 = vmatprep.mubr.bf16.mxu0 %v2937_v27 }
 0x13e   : > { %2659 = vmatprep.mubr.msk.bf16.mxu1 %vm3190_vm2, %v3189_v32 }
 0x13f   : > { %2626 = vmatpush3.bf16.msra.mxu0 %v2920_v13  ;;  %v2959_v13 = vld [vmem:[%s3490_s7 + $0x8] sm:$0xff]  }
 0x140   : > { %2646 = vmatpush3.bf16.msra.mxu1 %v2930_v28  ;;  %2627 = vmatprep.subr.bf16.mxu0 %v2921_v14 }
 0x141   : > { %2647 = vmatprep.subr.bf16.mxu1 %v3189_v32 }
 0x143   : > { %2628 = vmatpush3.bf16.msra.mxu0 %v2921_v14  ;;  %v2962_v14 = vld [vmem:[%s3490_s7 + $0x8] sm:$0xff]   ;;  %s3191_s7 = smov [#allocation9]  }
 0x144   : > { %2648 = vmatpush3.bf16.msra.mxu1 %v2931_v29  ;;  %2629 = vmatprep.subr.bf16.mxu0 %v2922_v15  ;;  %s3056_s26 = sshll.u32 %s3191_s7, 4  ;;  %s3057_s26 = int_to_ptr.vmem [resolvable:$false] %s3056_s26 }
 0x145   : > { %2649 = vmatprep.subr.bf16.mxu1 %v3189_v32  ;;  %s3058_s28 = scalar_lea.vmem %s3057_s26, 1024  ;;  %p3059_p2 = scmp.lt.s32.totalorder %s3702_s15, %s3057_s26 }
 0x146   : > { %p3060_p4 = scmp.lt.s32.totalorder %s3058_s28, %s3052_s14 }
 0x147   : > { %2630 = vmatpush3.bf16.msra.mxu0 %v2922_v15 }
 0x148   : > { %2650 = vmatpush3.bf16.msra.mxu1 %v2932_v30  ;;  %2631 = vmatprep.subr.bf16.mxu0 %v2923_v16  ;;  %p3061_p11 = por %p3060_p4, %p3059_p2 }
 0x149   : > { %2651 = vmatprep.subr.bf16.mxu1 %v3189_v32 }
 0x14a   : > { %p3062_p6 = pnand %p3061_p11, %p3055_p13 }
 0x14b   : > { %2632 = vmatpush3.bf16.msra.mxu0 %v2923_v16 }
 0x14c   : > { %2652 = vmatpush3.bf16.msra.mxu1 %v2933_v31  ;;  %2633 = vmatprep.subr.bf16.mxu0 %v2924_v18 }
 0x14d   : > { %2653 = vmatprep.subr.bf16.mxu1 %v3189_v32 }
 0x14f   : > { %2634 = vmatpush3.bf16.msra.mxu0 %v2924_v18 }
 0x150   : > { %2654 = vmatpush3.bf16.msra.mxu1 %v2934_v33  ;;  %2635 = vmatprep.subr.bf16.mxu0 %v2925_v20 }
 0x151   : > { %2655 = vmatprep.subr.bf16.mxu1 %v3189_v32 }
 0x153   : > { %2636 = vmatpush3.bf16.msra.mxu0 %v2925_v20 }
 0x154   : > { %2656 = vmatpush3.bf16.msra.mxu1 %v2935_v34  ;;  %2637 = vmatprep.subr.bf16.mxu0 %v2926_v23 }
 0x155   : > { %2657 = vmatprep.subr.bf16.mxu1 %v3189_v32 }
 0x157   : > { %2638 = vmatpush3.bf16.msra.mxu0 %v2926_v23 }
 0x158   : > { %2658 = vmatpush3.bf16.msra.mxu1 %v2936_v36  ;;  %2663 = vmatprep.subr.bf16.mxu0 %v2929_v26 }
 0x159   : > { %2683 = vmatprep.subr.bf16.mxu1 %v3189_v32 }
 0x15a   : > { %2640 = vmatmul.mubr.bf16.vlgmr.msra.gmra.mrb[20].mxu0 %v2938_v37 }
 0x15b   : > { %2660 = vmatmul.mubr.bf16.vlgmr.msra.gmra.mrb[20].mxu1 %v1476_v38  ;;  %2664 = vmatpush3.bf16.msra.mxu0 %v2929_v26 }
 0x15c   : > { %2684 = vmatpush3.bf16.msra.mxu1 %v2940_v39  ;;  %2665 = vmatprep.subr.bf16.mxu0 %v2930_v28 }
 0x15d   : > { %2685 = vmatprep.subr.bf16.mxu1 %v3189_v32  ;;  %2679 = vmatprep.mubr.bf16.mxu0 %v2948_v40 }
 0x15e   : > { %2699 = vmatprep.mubr.msk.bf16.mxu1 %vm3190_vm2, %v3189_v32 }
 0x15f   : > { %2666 = vmatpush3.bf16.msra.mxu0 %v2930_v28 }
 0x160   : > { %2686 = vmatpush3.bf16.msra.mxu1 %v2941_v41  ;;  %2667 = vmatprep.subr.bf16.mxu0 %v2931_v29 }
 0x161   : > { %2687 = vmatprep.subr.bf16.mxu1 %v3189_v32 }
 0x163   : > { %2668 = vmatpush3.bf16.msra.mxu0 %v2931_v29 }
 0x164   : > { %2688 = vmatpush3.bf16.msra.mxu1 %v2942_v42  ;;  %2669 = vmatprep.subr.bf16.mxu0 %v2932_v30 }
 0x165   : > { %2689 = vmatprep.subr.bf16.mxu1 %v3189_v32 }
 0x167   : > { %2670 = vmatpush3.bf16.msra.mxu0 %v2932_v30 }
 0x168   : > { %2690 = vmatpush3.bf16.msra.mxu1 %v2943_v43  ;;  %2671 = vmatprep.subr.bf16.mxu0 %v2933_v31 }
 0x169   : > { %2691 = vmatprep.subr.bf16.mxu1 %v3189_v32 }
 0x16b   : > { %2672 = vmatpush3.bf16.msra.mxu0 %v2933_v31 }
 0x16c   : > { %2692 = vmatpush3.bf16.msra.mxu1 %v2944_v44  ;;  %2673 = vmatprep.subr.bf16.mxu0 %v2934_v33 }
 0x16d   : > { %2693 = vmatprep.subr.bf16.mxu1 %v3189_v32 }
 0x16f   : > { %2674 = vmatpush3.bf16.msra.mxu0 %v2934_v33 }
 0x170   : > { %2694 = vmatpush3.bf16.msra.mxu1 %v2945_v45  ;;  %2675 = vmatprep.subr.bf16.mxu0 %v2935_v34 }
 0x171   : > { %2695 = vmatprep.subr.bf16.mxu1 %v3189_v32 }
 0x173   : > { %2676 = vmatpush3.bf16.msra.mxu0 %v2935_v34 }
 0x174   : > { %2696 = vmatpush3.bf16.msra.mxu1 %v3674_v47  ;;  %2677 = vmatprep.subr.bf16.mxu0 %v2936_v36 }
 0x175   : > { %2697 = vmatprep.subr.bf16.mxu1 %v3189_v32  ;;  %v2954_v32 = vld [vmem:[#allocation8 + $0x218] sm:$0xff]  }
 0x177   : > { %2678 = vmatpush3.bf16.msra.mxu0 %v2936_v36 }
 0x178   : > { %2698 = vmatpush3.bf16.msra.mxu1 %v3678_v49  ;;  %2703 = vmatprep.subr.bf16.mxu0 %v2940_v39 }
 0x179   : > { %2723 = vmatprep.subr.bf16.mxu1 %v2951_v50 }
 0x17a   : > { %2680 = vmatmul.mubr.bf16.vlgmr.msra.gmra.mrb[24].mxu0 %v2949_v51 }
 0x17b   : > { %2700 = vmatmul.mubr.bf16.vlgmr.msra.gmra.mrb[24].mxu1 %v1670_v52  ;;  %2704 = vmatpush3.bf16.msra.mxu0 %v2940_v39 }
 0x17c   : > { %2705 = vmatprep.subr.bf16.mxu0 %v2941_v41  ;;  %2724 = vmatpush3.bf16.msra.mxu1 %v2951_v50 }
 0x17d   : > { %2725 = vmatprep.subr.bf16.mxu1 %v2952_v53  ;;  %2719 = vmatprep.mubr.bf16.mxu0 %v2957_v54 }
 0x17e   : > { %2739 = vmatprep.mubr.bf16.mxu1 %v2961_v55 }
 0x17f   : > { %2706 = vmatpush3.bf16.msra.mxu0 %v2941_v41 }
 0x180   : > { %2707 = vmatprep.subr.bf16.mxu0 %v2942_v42  ;;  %2726 = vmatpush3.bf16.msra.mxu1 %v2952_v53 }
 0x181   : > { %2727 = vmatprep.subr.bf16.mxu1 %v2953_v56 }
 0x183   : > { %2708 = vmatpush3.bf16.msra.mxu0 %v2942_v42 }
 0x184   : > { %2709 = vmatprep.subr.bf16.mxu0 %v2943_v43  ;;  %2728 = vmatpush3.bf16.msra.mxu1 %v2953_v56 }
 0x185   : > { %2729 = vmatprep.subr.bf16.mxu1 %v2954_v32 }
 0x187   : > { %2710 = vmatpush3.bf16.msra.mxu0 %v2943_v43 }
 0x188   : > { %2711 = vmatprep.subr.bf16.mxu0 %v2944_v44  ;;  %2730 = vmatpush3.bf16.msra.mxu1 %v2954_v32 }
 0x189   : > { %2731 = vmatprep.subr.bf16.mxu1 %v2955_v57 }
 0x18b   : > { %2712 = vmatpush3.bf16.msra.mxu0 %v2944_v44 }
 0x18c   : > { %2713 = vmatprep.subr.bf16.mxu0 %v2945_v45  ;;  %2732 = vmatpush3.bf16.msra.mxu1 %v2955_v57 }
 0x18d   : > { %v2441_v60 = vpop.f32.mrb[0].mxu0  ;;  %2733 = vmatprep.subr.bf16.mxu1 %v2956_v58 }
 0x18e   : > { %v476_v62 = vadd.f32 %v2441_v60, %v2171_v59  ;;  %v459_v63 = vpop.f32.mrb[1].mxu0  ;;  %v2461_v0 = vpop.f32.mrb[0].mxu1 }
 0x18f   : > { %v474_v1 = vadd.f32 %v2171_v59, %v459_v63  ;;  %v2442_v2 = vpop.f32.mrb[2].mxu0  ;;  %2714 = vmatpush3.bf16.msra.mxu0 %v2945_v45  ;;  %v617_v3 = vpop.f32.mrb[1].mxu1 }
 0x190   : > { %v477_v4 = vadd.f32 %v2442_v2, %v2171_v59  ;;  %v462_v5 = vpop.f32.mrb[3].mxu0  ;;  %2715 = vmatprep.subr.bf16.mxu0 %v3674_v47  ;;  %v634_v6 = vadd.f32 %v2461_v0, %v476_v62  ;;  %2734 = vmatpush3.bf16.msra.mxu1 %v2956_v58  ;;  %v2462_v7 = vpop.f32.mrb[2].mxu1 }
 0x191   : > { %v475_v8 = vadd.f32 %v2171_v59, %v462_v5  ;;  %v632_v9 = vadd.f32 %v617_v3, %v474_v1  ;;  %v620_v10 = vpop.f32.mrb[3].mxu1  ;;  %2735 = vmatprep.subr.bf16.mxu1 %v2958_v61 }
 0x192   : > { %481 = vst [vmem:[#allocation2 + $0x18] sm:$0xff] %v477_v4 }
 0x193   : > { %2716 = vmatpush3.bf16.msra.mxu0 %v3674_v47  ;;  %v633_v12 = vadd.f32 %v620_v10, %v475_v8 }
 0x194   : > { %2717 = vmatprep.subr.bf16.mxu0 %v3678_v49  ;;  %2736 = vmatpush3.bf16.msra.mxu1 %v2958_v61 }
 0x195   : > { %2737 = vmatprep.subr.bf16.mxu1 %v2960_v11 }
 0x197   : > { %2718 = vmatpush3.bf16.msra.mxu0 %v3678_v49 }
 0x198   : > { %2738 = vmatpush3.bf16.msra.mxu1 %v2960_v11 }
 0x199   : > { %v506_v15 = vld [vmem:[#allocation2 + $0x18] sm:$0x7f]  ;;  %v641_v17 = vld [vmem:[#allocation2 + $0x1f] sm:$0x1] }
 0x19a   : > { %v635_v16 = vadd.f32 %v2462_v7, %v506_v15  ;;  %2720 = vmatmul.mubr.bf16.vlgmr.msra.gmra.mrb[28].mxu0 %v2959_v13 }
 0x19b   : > { %2740 = vmatmul.mubr.bf16.vlgmr.msra.gmra.mrb[28].mxu1 %v2962_v14 }
 0x19c   : > { %639 = vst [vmem:[#allocation2 + $0x18] sm:$0x7f] %v635_v16 }
 0x1a3   : > { %v708_v26 = vld [vmem:[#allocation2 + $0x18] sm:$0x3f] }
 0x1ad   : > { %v676_v18 = vpop.f32.mrb[4].mxu0 }
 0x1ae   : > { %v682_v19 = vadd.f32 %v676_v18, %v641_v17  ;;  %v2501_v20 = vpop.f32.mrb[4].mxu1  ;;  %v2481_v21 = vpop.f32.mrb[5].mxu0 }
 0x1af   : > { %v824_v22 = vadd.f32 %v2501_v20, %v634_v6  ;;  %v807_v23 = vpop.f32.mrb[5].mxu1  ;;  %v679_v24 = vpop.f32.mrb[6].mxu0 }
 0x1b0   : > { %683 = vst [vmem:[#allocation2 + $0x1f] sm:$0x1] %v682_v19  ;;  %v822_v25 = vadd.f32 %v807_v23, %v632_v9  ;;  %v2502_v27 = vpop.f32.mrb[6].mxu1  ;;  %v2482_v28 = vpop.f32.mrb[7].mxu0 }
 0x1b1   : > { %828 = vst [vmem:[#allocation2 + $0x10] sm:$0xff] %v824_v22  ;;  %v825_v29 = vadd.f32 %v2502_v27, %v708_v26  ;;  %v810_v30 = vpop.f32.mrb[7].mxu1 }
 0x1b2   : > { %v823_v31 = vadd.f32 %v810_v30, %v633_v12 }
 0x1b3   : > { %829 = vst [vmem:[#allocation2 + $0x18] sm:$0x3f] %v825_v29 }
 0x1b7   : > { %v831_v33 = vld [vmem:[#allocation2 + $0x1e] sm:$0x3] }
 0x1b8   : > { %v896_v36 = vld [vmem:[#allocation2 + $0x10] sm:$0x1] }
 0x1ba   : > { %v1029_v47 = vld [vmem:[#allocation2 + $0x11] sm:$0xff] }
 0x1cd   : > { %v866_v34 = vpop.f32.mrb[8].mxu0 }
 0x1ce   : > { %v872_v35 = vadd.f32 %v866_v34, %v831_v33  ;;  %v2541_v37 = vpop.f32.mrb[8].mxu1  ;;  %v2521_v38 = vpop.f32.mrb[9].mxu0 }
 0x1cf   : > { %v1023_v39 = vadd.f32 %v2541_v37, %v896_v36  ;;  %v1007_v40 = vpop.f32.mrb[9].mxu1  ;;  %v869_v41 = vpop.f32.mrb[10].mxu0 }
 0x1d0   : > { %873 = vst [vmem:[#allocation2 + $0x1e] sm:$0x3] %v872_v35  ;;  %v1021_v42 = vadd.f32 %v1007_v40, %v822_v25  ;;  %v2542_v43 = vpop.f32.mrb[10].mxu1  ;;  %v2522_v44 = vpop.f32.mrb[11].mxu0 }
 0x1d1   : > { %1026 = vst [vmem:[#allocation2 + $0x10] sm:$0x1] %v1023_v39  ;;  %v1010_v45 = vpop.f32.mrb[11].mxu1 }
 0x1d2   : > { %v1022_v46 = vadd.f32 %v1010_v45, %v823_v31 }
 0x1d7   : > { %v1030_v54 = vld [vmem:[#allocation2 + $0x19] sm:$0x7f] }
 0x1ed   : > { %v1071_v48 = vpop.f32.mrb[12].mxu0 }
 0x1ee   : > { %v1078_v49 = vadd.f32 %v1071_v48, %v1029_v47  ;;  %v1191_v50 = vpop.f32.mrb[12].mxu1  ;;  %v2561_v51 = vpop.f32.mrb[13].mxu0 }
 0x1ef   : > { %v1198_v52 = vadd.f32 %v1191_v50, %v1021_v42  ;;  %v2581_v53 = vpop.f32.mrb[13].mxu1  ;;  %v1074_v55 = vpop.f32.mrb[14].mxu0 }
 0x1f0   : > { %1080 = vst [vmem:[#allocation2 + $0x11] sm:$0xff] %v1078_v49  ;;  %v1079_v56 = vadd.f32 %v1074_v55, %v1030_v54  ;;  %v1194_v32 = vpop.f32.mrb[14].mxu1  ;;  %v2562_v57 = vpop.f32.mrb[15].mxu0 }
 0x1f1   : > { %v1199_v58 = vadd.f32 %v1194_v32, %v1022_v46  ;;  %v2582_v59 = vpop.f32.mrb[15].mxu1 }
 0x1f2   : > { %1081 = vst [vmem:[#allocation2 + $0x19] sm:$0x7f] %v1079_v56 }
 0x1f3   : > { %1201 = vst [vmem:[#allocation2 + $0x8] sm:$0xff] %v1199_v58 }
 0x1f7   : > { %v1204_v60 = vld [vmem:[#allocation2 + $0x10] sm:$0xff] }
 0x1f9   : > { %v1205_v3 = vld [vmem:[#allocation2 + $0x18] sm:$0xff] }
 0x1fa   : > { %v1277_v6 = vld [vmem:[#allocation2 + $0x8] sm:$0x7f] }
 0x20d   : > { %v1246_v61 = vpop.f32.mrb[16].mxu0 }
 0x20e   : > { %v1253_v62 = vadd.f32 %v1246_v61, %v1204_v60  ;;  %v1373_v63 = vpop.f32.mrb[16].mxu1  ;;  %v2601_v0 = vpop.f32.mrb[17].mxu0 }
 0x20f   : > { %v1380_v1 = vadd.f32 %v1373_v63, %v1198_v52  ;;  %v2621_v2 = vpop.f32.mrb[17].mxu1  ;;  %v1249_v4 = vpop.f32.mrb[18].mxu0 }
 0x210   : > { %1255 = vst [vmem:[#allocation2 + $0x10] sm:$0xff] %v1253_v62  ;;  %v1254_v5 = vadd.f32 %v1249_v4, %v1205_v3  ;;  %v1376_v7 = vpop.f32.mrb[18].mxu1  ;;  %v2602_v8 = vpop.f32.mrb[19].mxu0 }
 0x211   : > { %1382 = vst [vmem:[#allocation2] sm:$0xff] %v1380_v1  ;;  %v1381_v9 = vadd.f32 %v1376_v7, %v1277_v6  ;;  %v2622_v10 = vpop.f32.mrb[19].mxu1 }
 0x212   : > { %1256 = vst [vmem:[#allocation2 + $0x18] sm:$0xff] %v1254_v5 }
 0x213   : > { %1383 = vst [vmem:[#allocation2 + $0x8] sm:$0x7f] %v1381_v9 }
 0x217   : > { %v1387_v16 = vld [vmem:[#allocation2 + $0xf] sm:$0xff] }
 0x218   : > { %v1472_v14 = vld [vmem:[#allocation2] sm:$0x3] }
 0x219   : > { %v1389_v11 = vld [vmem:[#allocation2 + $0x1f] sm:$0x1]  ;;  %v1388_v22 = vld [vmem:[#allocation2 + $0x17] sm:$0xff] }
 0x21a   : > { %v1572_v33 = vld [vmem:[#allocation2 + $0x2] sm:$0xff] }
 0x22d   : > { %v2641_v12 = vpop.f32.mrb[20].mxu0 }
 0x22e   : > { %v1450_v13 = vadd.f32 %v2641_v12, %v1389_v11  ;;  %v1560_v15 = vpop.f32.mrb[20].mxu1  ;;  %v1434_v17 = vpop.f32.mrb[21].mxu0 }
 0x22f   : > { %v1566_v18 = vadd.f32 %v1560_v15, %v1472_v14  ;;  %v1448_v19 = vadd.f32 %v1434_v17, %v1387_v16  ;;  %v2642_v20 = vpop.f32.mrb[22].mxu0  ;;  %v2661_v21 = vpop.f32.mrb[21].mxu1 }
 0x230   : > { %1453 = vst [vmem:[#allocation2 + $0x1f] sm:$0x1] %v1450_v13  ;;  %v1437_v23 = vpop.f32.mrb[23].mxu0  ;;  %v1563_v24 = vpop.f32.mrb[22].mxu1 }
 0x231   : > { %1567 = vst [vmem:[#allocation2] sm:$0x3] %v1566_v18  ;;  %1451 = vst [vmem:[#allocation2 + $0xf] sm:$0xff] %v1448_v19  ;;  %v1449_v25 = vadd.f32 %v1437_v23, %v1388_v22  ;;  %v2662_v26 = vpop.f32.mrb[23].mxu1 }
 0x233   : > { %1452 = vst [vmem:[#allocation2 + $0x17] sm:$0xff] %v1449_v25 }
 0x238   : > { %v1663_v30 = vld [vmem:[#allocation2] sm:$0x1]  ;;  %v1573_v41 = vld [vmem:[#allocation2 + $0xa] sm:$0xff] }
 0x23a   : > { %v1574_v27 = vld [vmem:[#allocation2 + $0x12] sm:$0xff]  ;;  %v1575_v37 = vld [vmem:[#allocation2 + $0x1a] sm:$0x3f] }
 0x24d   : > { %v2681_v28 = vpop.f32.mrb[24].mxu0 }
 0x24e   : > { %v1639_v29 = vadd.f32 %v2681_v28, %v1574_v27  ;;  %v1754_v31 = vpop.f32.mrb[24].mxu1  ;;  %v1622_v34 = vpop.f32.mrb[25].mxu0 }
 0x24f   : > { %v1760_v35 = vadd.f32 %v1754_v31, %v1663_v30  ;;  %v1637_v36 = vadd.f32 %v1622_v34, %v1572_v33  ;;  %v2682_v38 = vpop.f32.mrb[26].mxu0  ;;  %v2701_v39 = vpop.f32.mrb[25].mxu1 }
 0x250   : > { %1643 = vst [vmem:[#allocation2 + $0x12] sm:$0xff] %v1639_v29  ;;  %v1640_v40 = vadd.f32 %v2682_v38, %v1575_v37  ;;  %v1625_v42 = vpop.f32.mrb[27].mxu0  ;;  %v1757_v43 = vpop.f32.mrb[26].mxu1 }
 0x251   : > { %1761 = vst [vmem:[#allocation2] sm:$0x1] %v1760_v35  ;;  %1641 = vst [vmem:[#allocation2 + $0x2] sm:$0xff] %v1637_v36  ;;  %v1638_v44 = vadd.f32 %v1625_v42, %v1573_v41  ;;  %v2702_v45 = vpop.f32.mrb[27].mxu1 }
 0x252   : > { %1644 = vst [vmem:[#allocation2 + $0x1a] sm:$0x3f] %v1640_v40 }
 0x253   : > { %1642 = vst [vmem:[#allocation2 + $0xa] sm:$0xff] %v1638_v44 }
 0x258   : > { %v1766_v49 = vld [vmem:[#allocation2 + $0x1] sm:$0xff] }
 0x259   : > { %v1769_v53 = vld [vmem:[#allocation2 + $0x19] sm:$0x7f] }
 0x25a   : > { %v1768_v46 = vld [vmem:[#allocation2 + $0x11] sm:$0xff]  ;;  %v1767_v32 = vld [vmem:[#allocation2 + $0x9] sm:$0xff] }
 0x26d   : > { %v2721_v47 = vpop.f32.mrb[28].mxu0 }
 0x26e   : > { %v1833_v48 = vadd.f32 %v2721_v47, %v1768_v46  ;;  %v1816_v50 = vpop.f32.mrb[29].mxu0  ;;  %v2741_v51 = vpop.f32.mrb[28].mxu1 }
 0x26f   : > { %v1831_v52 = vadd.f32 %v1816_v50, %v1766_v49  ;;  %v2722_v54 = vpop.f32.mrb[30].mxu0  ;;  %v1958_v55 = vpop.f32.mrb[29].mxu1 }
 0x270   : > { %1837 = vst [vmem:[#allocation2 + $0x11] sm:$0xff] %v1833_v48  ;;  %v1834_v56 = vadd.f32 %v2722_v54, %v1769_v53  ;;  %v1819_v57 = vpop.f32.mrb[31].mxu0  ;;  %v2742_v58 = vpop.f32.mrb[30].mxu1 }
 0x271   : > { %1835 = vst [vmem:[#allocation2 + $0x1] sm:$0xff] %v1831_v52  ;;  %v1832_v59 = vadd.f32 %v1819_v57, %v1767_v32  ;;  %v1961_v60 = vpop.f32.mrb[31].mxu1 }
 0x272   : > { %1838 = vst [vmem:[#allocation2 + $0x19] sm:$0x7f] %v1834_v56 }
 0x273   : > { %1836 = vst [vmem:[#allocation2 + $0x9] sm:$0xff] %v1832_v59 }
 0x278   : > { %v1860_v61 = vld [vmem:[#allocation2] sm:$0xff] }
 0x279   : > { %v1973_v62 = vadd.f32 %v1958_v55, %v1860_v61  ;;  %v1863_v63 = vld [vmem:[#allocation2 + $0x18] sm:$0xff] }
 0x27a   : > { %v1862_v0 = vld [vmem:[#allocation2 + $0x10] sm:$0xff]  ;;  %v1976_v1 = vadd.f32 %v2742_v58, %v1863_v63  ;;  %v1861_v2 = vld [vmem:[#allocation2 + $0x8] sm:$0xff] }
 0x27b   : > { %v1975_v3 = vadd.f32 %v2741_v51, %v1862_v0  ;;  %1977 = vst [vmem:[#allocation2] sm:$0xff] %v1973_v62  ;;  %v1974_v4 = vadd.f32 %v1961_v60, %v1861_v2  ;;  %v1985_v5 = vmax.f32 %v1973_v62, 0.0 }
 0x27c   : > { %1980 = vst [vmem:[#allocation2 + $0x18] sm:$0xff] %v1976_v1  ;;  %v1988_v6 = vmax.f32 %v1976_v1, 0.0 }
 0x27d   : > { %1979 = vst [vmem:[#allocation2 + $0x10] sm:$0xff] %v1975_v3  ;;  %1978 = vst [vmem:[#allocation2 + $0x8] sm:$0xff] %v1974_v4  ;;  %v1986_v7 = vmax.f32 %v1974_v4, 0.0  ;;  %v1987_v8 = vmax.f32 %v1975_v3, 0.0 }
 0x27e   : > { %1989 = vst [vmem:[%s321_s13] sm:$0xff] %v1985_v5  ;;  %1992 = vst [vmem:[%s321_s13 + $0x18] sm:$0xff] %v1988_v6 }
 0x27f   : > { %1990 = vst [vmem:[%s321_s13 + $0x8] sm:$0xff] %v1986_v7  ;;  %1991 = vst [vmem:[%s321_s13 + $0x10] sm:$0xff] %v1987_v8 }
 0x280   : > { %3065 = shalt.err (!%p3062_p6)
}
 0x281   : > { %s3066_s29 = scalar_lea.hbm %s3700_s4, 512  ;;  %s3070_s12 = scalar_lea.hbm %s3820_s5, 9216 }
 0x282   : > { %p3067_p10 = scmp.ne.s32.totalorder %s3700_s4, %s3066_s29  ;;  %p3071_p8 = scmp.lt.u32.totalorder %s3700_s4, %s3820_s5 }
 0x283   : > { %p3072_p3 = scmp.lt.u32.totalorder %s3070_s12, %s3066_s29  ;;  %p3074_p9 = scmp.lt.u32.totalorder %s3066_s29, %s3700_s4 }
 0x284   : > { %p3068_p1 = pnand %p3067_p10, %p3821_p7 }
 0x285   : > { %p3073_p5 = por %p3072_p3, %p3071_p8 }
 0x286   : > { %p3069_p0 = pneg %p3068_p1 }
 0x287   : > { %p3075_p12 = por %p3074_p9, %p3073_p5 }
 0x289   : > { %p3076_p13 = pnand %p3075_p12, %p3069_p0 }
 0x28b   : > { %3079 = shalt.err (!%p3076_p13)
}
 0x28c   : > { %s3192_s21 = smov 128   ;;  %s3193_s3 = smov 8  }
 0x28d   : > { %2753 = dma.vmem_to_hbm [thread:$0]  (%p3821_p7), %s3702_s15, 512, %s3700_s4, %s1994_s27, %s3192_s21, %s3192_s21, %s3193_s3  }
 0x28e PF: > { %s3822_s13 = sld [smem:[#allocation14_spill]]  ;;  %s3823_s0 = sld [smem:[#allocation17_spill]] }
 0x28f   : > { %p2773_p2 = scmp.ge.s32.totalorder %s3182_s25, 2 }
 0x294   : > { %s2025_s10 = sand.u32 1, %s3822_s13   ;;  %p3824_p4 = scmp.ne.s32.totalorder %s3823_s0, 0 }
 0x295   : > { %s2026_s14 = scalar_lea.sflag [#allocation5], %s2025_s10 }
 0x296   : > { %p2767_p11 = pnand %p2773_p2, %p3824_p4 }
 0x298   : > { %3137 = dma.done.wait (!%p2767_p11), %s2026_s14, 512  }
 0x299   : > { %3139 = vsyncadd (!%p2767_p11), %s2026_s14, 4294966784  ;;  %s23_s25 = sadd.s32 1, %s3182_s25   ;;  %s3825_s11 = smov %s3359_s18 }
 0x29a   : > { %p20_p6 = scmp.ge.s32.totalorder %s23_s25, 20   ;;  %s3826_s2 = sld [smem:[#allocation18_spill]] }
 0x29b   : > { %s3827_s4 = sld [smem:[#allocation19_spill]]  ;;  %s3828_s15 = smov %s3146_s16 }
 0x29c   : > { %s3829_s16 = smov %s3150_s17  ;;  %s3830_s17 = smov %s3429_s30 }
 0x29d   : > { %s3831_s18 = smov %s3158_s19  ;;  %s3832_s19 = smov %s3162_s20 }
 0x29e   : > { %s3833_s20 = smov %s3825_s11  ;;  %s3834_s21 = smov %s3174_s23 }
 0x29f   : > { %s3835_s22 = smov %s3178_s24  ;;  %22 = sbr.rel (!%p20_p6) target bundleno = 16 (0x10), region = 110 }
 0x2a0   : > { %s3836_s23 = smov %s3826_s2 }
 0x2a1   : > { %s3837_s24 = smov %s3827_s4 }
 0x2a6   :  { %2031 = vsyncpa [#allocation4], 1 }
 0x2a7   :  { %2033 = vsyncpa [#allocation4 + $0x1], 1 }
 0x2a8   :  { %2034 = vsyncpa [#allocation7], 1 }
 0x2a9   :  { %2036 = vsyncpa [#allocation7 + $0x1], 1 }
 0x2aa   :  { %2037 = vsyncpa [#allocation5], 1 }
 0x2ab   :  { %2039 = vsyncpa [#allocation5 + $0x1], 1 }

</bundles_post_ra>
